<compile_context>
chip_gen: v5e
topology: v5e:2x2
jax: 0.10.0
libtpu: 0.0.40
codegen_flags: <defaults>
</compile_context>

<pallas_src>
import functools

import jax
import jax.numpy as jnp
from jax.experimental import pallas as pl
from jax.experimental.pallas import tpu as pltpu

B_SUBLANE = 8  # one sublane tile


def make_gru_disc_kernel(seq_len, batch, num_layers, hidden_size, in_dim):
    """Kernel Ref order:
         x (T, B, IN), h0 (L, B, H),
         w_ih (L, IN, 3H) bf16, w_hh (L, H, 3H) bf16,
         b_g (L, 1, 3H) f32, b_hn (L, 1, H) f32,
         head1 (H+1, 30) f32 [rows 0:H = W1^T, row H = b1],
         head2 (31, out) f32 [rows 0:30 = W2^T, row 30 = b2],
         out (B, out), h_n (L, B, H),
         scratch: seq (T*B, H) f32, gi (T*B, 3H) f32
    """
    T, B, L, H, IN = seq_len, batch, num_layers, hidden_size, in_dim

    def kernel(x_ref, h0_ref, wih_ref, whh_ref, bg_ref, bhn_ref,
               head1_ref, head2_ref, out_ref, hn_ref, seq_ref, gi_ref):
        h_last = None
        for l in range(L):
            w_hh = whh_ref[l]            # (H, 3H) bf16
            b_g = bg_ref[l]              # (1, 3H) f32 (r/z: b_ih+b_hh folded; n: b_ih only)
            b_hn = bhn_ref[l]            # (1, H)  f32 (b_hh for n; must stay inside r*(...))

            w_ih_full = wih_ref[l]       # (IN, 3H) bf16
            if l == 0:
                layer_in = x_ref[...].reshape(T * B, IN)   # (T*B, IN) f32
                w_ih = w_ih_full
            else:
                # Full read of the previous layer's sequence happens BEFORE this layer's
                # first seq_ref store (read-then-overwrite, ordered in program order).
                layer_in = seq_ref[...]                    # (T*B, H) f32
                w_ih = w_ih_full[:H, :]                    # (H, 3H)

            # Hoisted input->gates transform over all timesteps (M = T*B rows, one MXU op),
            # spilled to VMEM so the unrolled time loop re-loads one aligned slab per step.
            gi = jnp.dot(layer_in.astype(jnp.bfloat16), w_ih,
                         preferred_element_type=jnp.float32) + b_g    # (T*B, 3H) f32
            gi_ref[...] = gi

            h = h0_ref[l]                # (B, H) f32
            write_seq = (l + 1 < L)      # last layer's sequence is never consumed

            # Fully unrolled time recurrence (T static & small): a single merged 3H hidden
            # matmul per step is the only MXU op left on the serial chain.
            for t in range(T):
                gh = jnp.dot(h.astype(jnp.bfloat16), w_hh,
                             preferred_element_type=jnp.float32)       # (B, 3H)
                gi_t = gi_ref[t * B:(t + 1) * B, :]                    # (B, 3H) aligned load

                rz = gi_t[:, :2 * H] + gh[:, :2 * H]
                s = 0.5 * jnp.tanh(0.5 * rz) + 0.5                     # sigmoid via one tanh
                r = s[:, :H]
                z = s[:, H:]
                n = jnp.tanh(gi_t[:, 2 * H:] + r * (gh[:, 2 * H:] + b_hn))
                h = n + z * (h - n)                                    # == (1-z)*n + z*h

                if write_seq:
                    seq_ref[t * B:(t + 1) * B, :] = h                  # aligned sublane store

            hn_ref[l] = h
            h_last = h

        # gru_o[-1] == hidden of the last layer at the last timestep == h_last.
        head1 = head1_ref[...]
        head2 = head2_ref[...]
        lin1 = jnp.tanh(
            jnp.dot(h_last, head1[:H, :], preferred_element_type=jnp.float32)
            + head1[H:H + 1, :])                                        # (B, 30)
        out_ref[...] = (
            jnp.dot(lin1, head2[:30, :], preferred_element_type=jnp.float32)
            + head2[30:31, :])

    return kernel


def init_params(key, input_size, hidden_size, hidden_layer, output_size=1):
    """PyTorch-shaped parameters (nn.GRU / nn.Linear layouts)."""
    H = hidden_size
    params = {"gru": []}
    k = key
    for l in range(hidden_layer):
        in_l = input_size if l == 0 else H
        bound = 1.0 / jnp.sqrt(jnp.float32(H))
        k, k1, k2, k3, k4 = jax.random.split(k, 5)
        w_ih = jax.random.uniform(k1, (3 * H, in_l), jnp.float32, -bound, bound)
        w_hh = jax.random.uniform(k2, (3 * H, H), jnp.float32, -bound, bound)
        b_ih = jax.random.uniform(k3, (3 * H,), jnp.float32, -bound, bound)
        b_hh = jax.random.uniform(k4, (3 * H,), jnp.float32, -bound, bound)
        params["gru"].append((w_ih, w_hh, b_ih, b_hh))

    k, k1, k2, k3, k4 = jax.random.split(k, 5)
    b1 = 1.0 / jnp.sqrt(jnp.float32(H))
    params["w1"] = jax.random.uniform(k1, (30, H), jnp.float32, -b1, b1)
    params["b1"] = jax.random.uniform(k2, (30,), jnp.float32, -b1, b1)
    b2 = 1.0 / jnp.sqrt(jnp.float32(30))
    params["w2"] = jax.random.uniform(k3, (output_size, 30), jnp.float32, -b2, b2)
    params["b2"] = jax.random.uniform(k4, (output_size,), jnp.float32, -b2, b2)
    return params


def prepare_params(params, hidden_size):
    """One-time conversion to kernel layout: pre-transposed, merged 3H gate weights stacked
    over layers (bf16 matmul operands, f32 biases), r/z biases folded, head weights packed.
    """
    H = hidden_size
    in0 = params["gru"][0][0].shape[1]
    IN = max(in0, H)                       # common (zero-padded) input-feature dim

    w_ih_all, w_hh_all, b_g_all, b_hn_all = [], [], [], []
    for (w_ih, w_hh, b_ih, b_hh) in params["gru"]:
        in_l = w_ih.shape[1]
        # PyTorch gate row order: r [0:H], z [H:2H], n [2H:3H].
        wt = jnp.zeros((IN, 3 * H), jnp.float32).at[:in_l, :].set(jnp.transpose(w_ih))
        w_ih_all.append(wt)                                        # (IN, 3H)
        w_hh_all.append(jnp.transpose(w_hh))                       # (H, 3H)
        b_g_all.append(jnp.concatenate(
            [b_ih[:2 * H] + b_hh[:2 * H], b_ih[2 * H:]]).reshape(1, 3 * H))
        b_hn_all.append(b_hh[2 * H:].reshape(1, H))                # stays inside r*(...)

    kp = {
        "w_ih": jnp.stack(w_ih_all).astype(jnp.bfloat16),          # (L, IN, 3H)
        "w_hh": jnp.stack(w_hh_all).astype(jnp.bfloat16),          # (L, H, 3H)
        "b_g": jnp.stack(b_g_all).astype(jnp.float32),             # (L, 1, 3H)
        "b_hn": jnp.stack(b_hn_all).astype(jnp.float32),           # (L, 1, H)
        "head1": jnp.concatenate(
            [jnp.transpose(params["w1"]), params["b1"].reshape(1, -1)],
            axis=0).astype(jnp.float32),                           # (H+1, 30)
        "head2": jnp.concatenate(
            [jnp.transpose(params["w2"]), params["b2"].reshape(1, -1)],
            axis=0).astype(jnp.float32),                           # (31, out)
    }
    return kp


@functools.partial(jax.jit, static_argnames=("hidden_layer", "hidden_size", "output_size"))
def motion_discriminator_forward(kparams, motion_sequence, hidden_unit,
                                 hidden_layer, hidden_size, output_size):
    """motion_sequence: (batch, seq, input)   hidden_unit: (layers, batch, hidden)."""
    # PyTorch forward glue (hidden_unit-is-None branch): permute(1,0,2) + .float().
    x = jnp.transpose(motion_sequence, (1, 0, 2)).astype(jnp.float32)   # (T, B, I)
    T, B, I = x.shape
    L, H = hidden_layer, hidden_size
    IN = kparams["w_ih"].shape[1]          # padded input-feature dim (= max(I, H))

    # Pad batch to a full sublane tile so every per-step slice / store is aligned;
    # the padded rows (zero x, zero h0) are sliced off below and never consumed.
    B_BLK = B_SUBLANE
    B_pad = ((B + B_BLK - 1) // B_BLK) * B_BLK
    x_p = jnp.zeros((T, B_pad, IN), jnp.float32).at[:, :B, :I].set(x)
    h0_p = jnp.zeros((L, B_pad, H), jnp.float32).at[:, :B, :].set(
        hidden_unit.astype(jnp.float32))

    grid = (B_pad // B_BLK,)   # batch chunks; shards across TensorCores when > 1 (v7x)
    grid_spec = pltpu.PrefetchScalarGridSpec(
        num_scalar_prefetch=0,
        grid=grid,
        in_specs=[
            pl.BlockSpec((T, B_BLK, IN), lambda b: (0, b, 0)),
            pl.BlockSpec((L, B_BLK, H), lambda b: (0, b, 0)),
            pl.BlockSpec((L, IN, 3 * H), lambda b: (0, 0, 0)),
            pl.BlockSpec((L, H, 3 * H), lambda b: (0, 0, 0)),
            pl.BlockSpec((L, 1, 3 * H), lambda b: (0, 0, 0)),
            pl.BlockSpec((L, 1, H), lambda b: (0, 0, 0)),
            pl.BlockSpec((H + 1, 30), lambda b: (0, 0)),
            pl.BlockSpec((31, output_size), lambda b: (0, 0)),
        ],
        out_specs=(
            pl.BlockSpec((B_BLK, output_size), lambda b: (b, 0)),
            pl.BlockSpec((L, B_BLK, H), lambda b: (0, b, 0)),
        ),
        scratch_shapes=[
            pltpu.VMEM((T * B_BLK, H), jnp.float32),       # layer output sequence buffer
            pltpu.VMEM((T * B_BLK, 3 * H), jnp.float32),   # hoisted input->gates spill
        ],
    )

    out_p, hn_p = pl.pallas_call(
        make_gru_disc_kernel(T, B_BLK, L, H, IN),
        out_shape=(jax.ShapeDtypeStruct((B_pad, output_size), jnp.float32),
                   jax.ShapeDtypeStruct((L, B_pad, H), jnp.float32)),
        grid_spec=grid_spec,
        compiler_params=pltpu.CompilerParams(dimension_semantics=("parallel",)),
    )(x_p, h0_p, kparams["w_ih"], kparams["w_hh"], kparams["b_g"], kparams["b_hn"],
      kparams["head1"], kparams["head2"])

    return out_p[:B], hn_p[:, :B, :]


if __name__ == "__main__":
    # Small, module-consistent shapes.
    batch, seq, input_size = 2, 8, 16
    hidden_size, hidden_layer, output_size = 32, 2, 1

    root = jax.random.PRNGKey(0)
    k_params, k_x, k_h = jax.random.split(root, 3)

    params = init_params(k_params, input_size, hidden_size, hidden_layer, output_size)
    kparams = prepare_params(params, hidden_size)   # one-time kernel-layout conversion

    motion_sequence = jax.random.normal(k_x, (batch, seq, input_size), jnp.float32)
    # initHidden: randn(layer, num_samples, hidden_size)  (initial_hs_random=True path)
    hidden_unit = jax.random.normal(k_h, (hidden_layer, batch, hidden_size), jnp.float32)

    out, h_n = motion_discriminator_forward(
        kparams, motion_sequence, hidden_unit,
        hidden_layer=hidden_layer, hidden_size=hidden_size, output_size=output_size)
    jax.block_until_ready((out, h_n))

    assert out.shape == (batch, output_size)
    assert h_n.shape == (hidden_layer, batch, hidden_size)
    assert bool(jnp.all(jnp.isfinite(out))) and bool(jnp.all(jnp.isfinite(h_n)))
    print("KERNEL_OK")
</pallas_src>

<mosaic_0001>
module attributes {stable_mosaic.version = 11 : i64} {
  func.func @kernel(%arg0: i32, %arg1: memref<8x8x32xf32, #tpu.memory_space<vmem>>, %arg2: memref<2x8x32xf32, #tpu.memory_space<vmem>>, %arg3: memref<2x32x96xbf16, #tpu.memory_space<vmem>>, %arg4: memref<2x32x96xbf16, #tpu.memory_space<vmem>>, %arg5: memref<2x1x96xf32, #tpu.memory_space<vmem>>, %arg6: memref<2x1x32xf32, #tpu.memory_space<vmem>>, %arg7: memref<33x30xf32, #tpu.memory_space<vmem>>, %arg8: memref<31x1xf32, #tpu.memory_space<vmem>>, %arg9: memref<8x1xf32, #tpu.memory_space<vmem>>, %arg10: memref<2x8x32xf32, #tpu.memory_space<vmem>>, %arg11: memref<64x32xf32, #tpu.memory_space<vmem>>, %arg12: memref<64x96xf32, #tpu.memory_space<vmem>>) attributes {dimension_semantics = [#tpu.dimension_semantics<parallel>], iteration_bounds = array<i64: 1>, scalar_prefetch = 0 : i64, scratch_operands = 2 : i64, tpu.core_type = #tpu.core_type<tc>, window_params = [{transform_indices = @transform_0, window_bounds = array<i64: 8, 8, 32>}, {transform_indices = @transform_1, window_bounds = array<i64: 2, 8, 32>}, {pipeline_mode = #tpu.pipeline_mode<synchronous>, transform_indices = @transform_2, window_bounds = array<i64: 2, 32, 96>}, {pipeline_mode = #tpu.pipeline_mode<synchronous>, transform_indices = @transform_3, window_bounds = array<i64: 2, 32, 96>}, {pipeline_mode = #tpu.pipeline_mode<synchronous>, transform_indices = @transform_4, window_bounds = array<i64: 2, 1, 96>}, {pipeline_mode = #tpu.pipeline_mode<synchronous>, transform_indices = @transform_5, window_bounds = array<i64: 2, 1, 32>}, {pipeline_mode = #tpu.pipeline_mode<synchronous>, transform_indices = @transform_6, window_bounds = array<i64: 33, 30>}, {pipeline_mode = #tpu.pipeline_mode<synchronous>, transform_indices = @transform_7, window_bounds = array<i64: 31, 1>}, {transform_indices = @transform_8, window_bounds = array<i64: 8, 1>}, {transform_indices = @transform_9, window_bounds = array<i64: 2, 8, 32>}]} {
    %c0 = arith.constant 0 : index
    %c0_0 = arith.constant 0 : index
    %c0_1 = arith.constant 0 : index
    %0 = vector.load %arg4[%c0, %c0_0, %c0_1] : memref<2x32x96xbf16, #tpu.memory_space<vmem>>, vector<1x32x96xbf16>
    %1 = vector.shape_cast %0 : vector<1x32x96xbf16> to vector<32x96xbf16>
    %c0_2 = arith.constant 0 : index
    %c0_3 = arith.constant 0 : index
    %c0_4 = arith.constant 0 : index
    %2 = vector.load %arg5[%c0_2, %c0_3, %c0_4] : memref<2x1x96xf32, #tpu.memory_space<vmem>>, vector<1x1x96xf32>
    %3 = vector.shape_cast %2 : vector<1x1x96xf32> to vector<1x96xf32>
    %c0_5 = arith.constant 0 : index
    %c0_6 = arith.constant 0 : index
    %c0_7 = arith.constant 0 : index
    %4 = vector.load %arg6[%c0_5, %c0_6, %c0_7] : memref<2x1x32xf32, #tpu.memory_space<vmem>>, vector<1x1x32xf32>
    %5 = vector.shape_cast %4 : vector<1x1x32xf32> to vector<1x32xf32>
    %c0_8 = arith.constant 0 : index
    %c0_9 = arith.constant 0 : index
    %c0_10 = arith.constant 0 : index
    %6 = vector.load %arg3[%c0_8, %c0_9, %c0_10] : memref<2x32x96xbf16, #tpu.memory_space<vmem>>, vector<1x32x96xbf16>
    %7 = vector.shape_cast %6 : vector<1x32x96xbf16> to vector<32x96xbf16>
    %c0_11 = arith.constant 0 : index
    %c0_12 = arith.constant 0 : index
    %c0_13 = arith.constant 0 : index
    %8 = vector.load %arg1[%c0_11, %c0_12, %c0_13] : memref<8x8x32xf32, #tpu.memory_space<vmem>>, vector<8x8x32xf32>
    %9 = vector.shape_cast %8 : vector<8x8x32xf32> to vector<64x32xf32>
    %10 = arith.truncf %9 : vector<64x32xf32> to vector<64x32xbf16>
    %cst = arith.constant dense<0.000000e+00> : vector<64x96xf32>
    %11 = tpu.matmul %10, %7, %cst {dimension_numbers = #tpu.dot_dimension_numbers<[1], [0], [0], [1], [0, 0, 1, 1], [], []>} : vector<64x32xbf16>, vector<32x96xbf16>, vector<64x96xf32> -> vector<64x96xf32>
    %12 = vector.broadcast %3 : vector<1x96xf32> to vector<64x96xf32>
    %13 = arith.addf %11, %12 : vector<64x96xf32>
    %c0_14 = arith.constant 0 : index
    %c0_15 = arith.constant 0 : index
    %14 = vector.load %arg12[%c0_14, %c0_15] : memref<64x96xf32, #tpu.memory_space<vmem>>, vector<64x96xf32>
    tpu.vector_store %arg12[%c0_14, %c0_15], %13 {strides = array<i32>} : memref<64x96xf32, #tpu.memory_space<vmem>>, vector<64x96xf32>,
    %c0_16 = arith.constant 0 : index
    %c0_17 = arith.constant 0 : index
    %c0_18 = arith.constant 0 : index
    %15 = vector.load %arg2[%c0_16, %c0_17, %c0_18] : memref<2x8x32xf32, #tpu.memory_space<vmem>>, vector<1x8x32xf32>
    %16 = vector.shape_cast %15 : vector<1x8x32xf32> to vector<8x32xf32>
    %17 = arith.truncf %16 : vector<8x32xf32> to vector<8x32xbf16>
    %cst_19 = arith.constant dense<0.000000e+00> : vector<8x96xf32>
    %18 = tpu.matmul %17, %1, %cst_19 {dimension_numbers = #tpu.dot_dimension_numbers<[1], [0], [0], [1], [0, 0, 1, 1], [], []>} : vector<8x32xbf16>, vector<32x96xbf16>, vector<8x96xf32> -> vector<8x96xf32>
    %c0_20 = arith.constant 0 : index
    %c0_21 = arith.constant 0 : index
    %19 = vector.load %arg12[%c0_20, %c0_21] : memref<64x96xf32, #tpu.memory_space<vmem>>, vector<8x96xf32>
    %20 = vector.extract_strided_slice %19 {offsets = [0, 0], sizes = [8, 64], strides = [1, 1]} : vector<8x96xf32> to vector<8x64xf32>
    %21 = vector.extract_strided_slice %18 {offsets = [0, 0], sizes = [8, 64], strides = [1, 1]} : vector<8x96xf32> to vector<8x64xf32>
    %22 = arith.addf %20, %21 : vector<8x64xf32>
    %cst_22 = arith.constant 5.000000e-01 : f32
    %23 = vector.broadcast %cst_22 : f32 to vector<8x64xf32>
    %24 = arith.mulf %23, %22 : vector<8x64xf32>
    %25 = math.tanh %24 : vector<8x64xf32>
    %cst_23 = arith.constant 5.000000e-01 : f32
    %26 = vector.broadcast %cst_23 : f32 to vector<8x64xf32>
    %27 = arith.mulf %26, %25 : vector<8x64xf32>
    %cst_24 = arith.constant 5.000000e-01 : f32
    %28 = vector.broadcast %cst_24 : f32 to vector<8x64xf32>
    %29 = arith.addf %27, %28 : vector<8x64xf32>
    %30 = vector.extract_strided_slice %29 {offsets = [0, 0], sizes = [8, 32], strides = [1, 1]} : vector<8x64xf32> to vector<8x32xf32>
    %31 = vector.extract_strided_slice %29 {offsets = [0, 32], sizes = [8, 32], strides = [1, 1]} : vector<8x64xf32> to vector<8x32xf32>
    %32 = vector.extract_strided_slice %19 {offsets = [0, 64], sizes = [8, 32], strides = [1, 1]} : vector<8x96xf32> to vector<8x32xf32>
    %33 = vector.extract_strided_slice %18 {offsets = [0, 64], sizes = [8, 32], strides = [1, 1]} : vector<8x96xf32> to vector<8x32xf32>
    %34 = vector.broadcast %5 : vector<1x32xf32> to vector<8x32xf32>
    %35 = arith.addf %33, %34 : vector<8x32xf32>
    %36 = arith.mulf %30, %35 : vector<8x32xf32>
    %37 = arith.addf %32, %36 : vector<8x32xf32>
    %38 = math.tanh %37 : vector<8x32xf32>
    %39 = arith.subf %16, %38 : vector<8x32xf32>
    %40 = arith.mulf %31, %39 : vector<8x32xf32>
    %41 = arith.addf %38, %40 : vector<8x32xf32>
    %c0_25 = arith.constant 0 : index
    %c0_26 = arith.constant 0 : index
    %42 = vector.load %arg11[%c0_25, %c0_26] : memref<64x32xf32, #tpu.memory_space<vmem>>, vector<8x32xf32>
    tpu.vector_store %arg11[%c0_25, %c0_26], %41 {strides = array<i32>} : memref<64x32xf32, #tpu.memory_space<vmem>>, vector<8x32xf32>,
    %43 = arith.truncf %41 : vector<8x32xf32> to vector<8x32xbf16>
    %cst_27 = arith.constant dense<0.000000e+00> : vector<8x96xf32>
    %44 = tpu.matmul %43, %1, %cst_27 {dimension_numbers = #tpu.dot_dimension_numbers<[1], [0], [0], [1], [0, 0, 1, 1], [], []>} : vector<8x32xbf16>, vector<32x96xbf16>, vector<8x96xf32> -> vector<8x96xf32>
    %c8 = arith.constant 8 : index
    %c0_28 = arith.constant 0 : index
    %45 = vector.load %arg12[%c8, %c0_28] : memref<64x96xf32, #tpu.memory_space<vmem>>, vector<8x96xf32>
    %46 = vector.extract_strided_slice %45 {offsets = [0, 0], sizes = [8, 64], strides = [1, 1]} : vector<8x96xf32> to vector<8x64xf32>
    %47 = vector.extract_strided_slice %44 {offsets = [0, 0], sizes = [8, 64], strides = [1, 1]} : vector<8x96xf32> to vector<8x64xf32>
    %48 = arith.addf %46, %47 : vector<8x64xf32>
    %cst_29 = arith.constant 5.000000e-01 : f32
    %49 = vector.broadcast %cst_29 : f32 to vector<8x64xf32>
    %50 = arith.mulf %49, %48 : vector<8x64xf32>
    %51 = math.tanh %50 : vector<8x64xf32>
    %cst_30 = arith.constant 5.000000e-01 : f32
    %52 = vector.broadcast %cst_30 : f32 to vector<8x64xf32>
    %53 = arith.mulf %52, %51 : vector<8x64xf32>
    %cst_31 = arith.constant 5.000000e-01 : f32
    %54 = vector.broadcast %cst_31 : f32 to vector<8x64xf32>
    %55 = arith.addf %53, %54 : vector<8x64xf32>
    %56 = vector.extract_strided_slice %55 {offsets = [0, 0], sizes = [8, 32], strides = [1, 1]} : vector<8x64xf32> to vector<8x32xf32>
    %57 = vector.extract_strided_slice %55 {offsets = [0, 32], sizes = [8, 32], strides = [1, 1]} : vector<8x64xf32> to vector<8x32xf32>
    %58 = vector.extract_strided_slice %45 {offsets = [0, 64], sizes = [8, 32], strides = [1, 1]} : vector<8x96xf32> to vector<8x32xf32>
    %59 = vector.extract_strided_slice %44 {offsets = [0, 64], sizes = [8, 32], strides = [1, 1]} : vector<8x96xf32> to vector<8x32xf32>
    %60 = vector.broadcast %5 : vector<1x32xf32> to vector<8x32xf32>
    %61 = arith.addf %59, %60 : vector<8x32xf32>
    %62 = arith.mulf %56, %61 : vector<8x32xf32>
    %63 = arith.addf %58, %62 : vector<8x32xf32>
    %64 = math.tanh %63 : vector<8x32xf32>
    %65 = arith.subf %41, %64 : vector<8x32xf32>
    %66 = arith.mulf %57, %65 : vector<8x32xf32>
    %67 = arith.addf %64, %66 : vector<8x32xf32>
    %c8_32 = arith.constant 8 : index
    %c0_33 = arith.constant 0 : index
    %68 = vector.load %arg11[%c8_32, %c0_33] : memref<64x32xf32, #tpu.memory_space<vmem>>, vector<8x32xf32>
    tpu.vector_store %arg11[%c8_32, %c0_33], %67 {strides = array<i32>} : memref<64x32xf32, #tpu.memory_space<vmem>>, vector<8x32xf32>,
    %69 = arith.truncf %67 : vector<8x32xf32> to vector<8x32xbf16>
    %cst_34 = arith.constant dense<0.000000e+00> : vector<8x96xf32>
    %70 = tpu.matmul %69, %1, %cst_34 {dimension_numbers = #tpu.dot_dimension_numbers<[1], [0], [0], [1], [0, 0, 1, 1], [], []>} : vector<8x32xbf16>, vector<32x96xbf16>, vector<8x96xf32> -> vector<8x96xf32>
    %c16 = arith.constant 16 : index
    %c0_35 = arith.constant 0 : index
    %71 = vector.load %arg12[%c16, %c0_35] : memref<64x96xf32, #tpu.memory_space<vmem>>, vector<8x96xf32>
    %72 = vector.extract_strided_slice %71 {offsets = [0, 0], sizes = [8, 64], strides = [1, 1]} : vector<8x96xf32> to vector<8x64xf32>
    %73 = vector.extract_strided_slice %70 {offsets = [0, 0], sizes = [8, 64], strides = [1, 1]} : vector<8x96xf32> to vector<8x64xf32>
    %74 = arith.addf %72, %73 : vector<8x64xf32>
    %cst_36 = arith.constant 5.000000e-01 : f32
    %75 = vector.broadcast %cst_36 : f32 to vector<8x64xf32>
    %76 = arith.mulf %75, %74 : vector<8x64xf32>
    %77 = math.tanh %76 : vector<8x64xf32>
    %cst_37 = arith.constant 5.000000e-01 : f32
    %78 = vector.broadcast %cst_37 : f32 to vector<8x64xf32>
    %79 = arith.mulf %78, %77 : vector<8x64xf32>
    %cst_38 = arith.constant 5.000000e-01 : f32
    %80 = vector.broadcast %cst_38 : f32 to vector<8x64xf32>
    %81 = arith.addf %79, %80 : vector<8x64xf32>
    %82 = vector.extract_strided_slice %81 {offsets = [0, 0], sizes = [8, 32], strides = [1, 1]} : vector<8x64xf32> to vector<8x32xf32>
    %83 = vector.extract_strided_slice %81 {offsets = [0, 32], sizes = [8, 32], strides = [1, 1]} : vector<8x64xf32> to vector<8x32xf32>
    %84 = vector.extract_strided_slice %71 {offsets = [0, 64], sizes = [8, 32], strides = [1, 1]} : vector<8x96xf32> to vector<8x32xf32>
    %85 = vector.extract_strided_slice %70 {offsets = [0, 64], sizes = [8, 32], strides = [1, 1]} : vector<8x96xf32> to vector<8x32xf32>
    %86 = vector.broadcast %5 : vector<1x32xf32> to vector<8x32xf32>
    %87 = arith.addf %85, %86 : vector<8x32xf32>
    %88 = arith.mulf %82, %87 : vector<8x32xf32>
    %89 = arith.addf %84, %88 : vector<8x32xf32>
    %90 = math.tanh %89 : vector<8x32xf32>
    %91 = arith.subf %67, %90 : vector<8x32xf32>
    %92 = arith.mulf %83, %91 : vector<8x32xf32>
    %93 = arith.addf %90, %92 : vector<8x32xf32>
    %c16_39 = arith.constant 16 : index
    %c0_40 = arith.constant 0 : index
    %94 = vector.load %arg11[%c16_39, %c0_40] : memref<64x32xf32, #tpu.memory_space<vmem>>, vector<8x32xf32>
    tpu.vector_store %arg11[%c16_39, %c0_40], %93 {strides = array<i32>} : memref<64x32xf32, #tpu.memory_space<vmem>>, vector<8x32xf32>,
    %95 = arith.truncf %93 : vector<8x32xf32> to vector<8x32xbf16>
    %cst_41 = arith.constant dense<0.000000e+00> : vector<8x96xf32>
    %96 = tpu.matmul %95, %1, %cst_41 {dimension_numbers = #tpu.dot_dimension_numbers<[1], [0], [0], [1], [0, 0, 1, 1], [], []>} : vector<8x32xbf16>, vector<32x96xbf16>, vector<8x96xf32> -> vector<8x96xf32>
    %c24 = arith.constant 24 : index
    %c0_42 = arith.constant 0 : index
    %97 = vector.load %arg12[%c24, %c0_42] : memref<64x96xf32, #tpu.memory_space<vmem>>, vector<8x96xf32>
    %98 = vector.extract_strided_slice %97 {offsets = [0, 0], sizes = [8, 64], strides = [1, 1]} : vector<8x96xf32> to vector<8x64xf32>
    %99 = vector.extract_strided_slice %96 {offsets = [0, 0], sizes = [8, 64], strides = [1, 1]} : vector<8x96xf32> to vector<8x64xf32>
    %100 = arith.addf %98, %99 : vector<8x64xf32>
    %cst_43 = arith.constant 5.000000e-01 : f32
    %101 = vector.broadcast %cst_43 : f32 to vector<8x64xf32>
    %102 = arith.mulf %101, %100 : vector<8x64xf32>
    %103 = math.tanh %102 : vector<8x64xf32>
    %cst_44 = arith.constant 5.000000e-01 : f32
    %104 = vector.broadcast %cst_44 : f32 to vector<8x64xf32>
    %105 = arith.mulf %104, %103 : vector<8x64xf32>
    %cst_45 = arith.constant 5.000000e-01 : f32
    %106 = vector.broadcast %cst_45 : f32 to vector<8x64xf32>
    %107 = arith.addf %105, %106 : vector<8x64xf32>
    %108 = vector.extract_strided_slice %107 {offsets = [0, 0], sizes = [8, 32], strides = [1, 1]} : vector<8x64xf32> to vector<8x32xf32>
    %109 = vector.extract_strided_slice %107 {offsets = [0, 32], sizes = [8, 32], strides = [1, 1]} : vector<8x64xf32> to vector<8x32xf32>
    %110 = vector.extract_strided_slice %97 {offsets = [0, 64], sizes = [8, 32], strides = [1, 1]} : vector<8x96xf32> to vector<8x32xf32>
    %111 = vector.extract_strided_slice %96 {offsets = [0, 64], sizes = [8, 32], strides = [1, 1]} : vector<8x96xf32> to vector<8x32xf32>
    %112 = vector.broadcast %5 : vector<1x32xf32> to vector<8x32xf32>
    %113 = arith.addf %111, %112 : vector<8x32xf32>
    %114 = arith.mulf %108, %113 : vector<8x32xf32>
    %115 = arith.addf %110, %114 : vector<8x32xf32>
    %116 = math.tanh %115 : vector<8x32xf32>
    %117 = arith.subf %93, %116 : vector<8x32xf32>
    %118 = arith.mulf %109, %117 : vector<8x32xf32>
    %119 = arith.addf %116, %118 : vector<8x32xf32>
    %c24_46 = arith.constant 24 : index
    %c0_47 = arith.constant 0 : index
    %120 = vector.load %arg11[%c24_46, %c0_47] : memref<64x32xf32, #tpu.memory_space<vmem>>, vector<8x32xf32>
    tpu.vector_store %arg11[%c24_46, %c0_47], %119 {strides = array<i32>} : memref<64x32xf32, #tpu.memory_space<vmem>>, vector<8x32xf32>,
    %121 = arith.truncf %119 : vector<8x32xf32> to vector<8x32xbf16>
    %cst_48 = arith.constant dense<0.000000e+00> : vector<8x96xf32>
    %122 = tpu.matmul %121, %1, %cst_48 {dimension_numbers = #tpu.dot_dimension_numbers<[1], [0], [0], [1], [0, 0, 1, 1], [], []>} : vector<8x32xbf16>, vector<32x96xbf16>, vector<8x96xf32> -> vector<8x96xf32>
    %c32 = arith.constant 32 : index
    %c0_49 = arith.constant 0 : index
    %123 = vector.load %arg12[%c32, %c0_49] : memref<64x96xf32, #tpu.memory_space<vmem>>, vector<8x96xf32>
    %124 = vector.extract_strided_slice %123 {offsets = [0, 0], sizes = [8, 64], strides = [1, 1]} : vector<8x96xf32> to vector<8x64xf32>
    %125 = vector.extract_strided_slice %122 {offsets = [0, 0], sizes = [8, 64], strides = [1, 1]} : vector<8x96xf32> to vector<8x64xf32>
    %126 = arith.addf %124, %125 : vector<8x64xf32>
    %cst_50 = arith.constant 5.000000e-01 : f32
    %127 = vector.broadcast %cst_50 : f32 to vector<8x64xf32>
    %128 = arith.mulf %127, %126 : vector<8x64xf32>
    %129 = math.tanh %128 : vector<8x64xf32>
    %cst_51 = arith.constant 5.000000e-01 : f32
    %130 = vector.broadcast %cst_51 : f32 to vector<8x64xf32>
    %131 = arith.mulf %130, %129 : vector<8x64xf32>
    %cst_52 = arith.constant 5.000000e-01 : f32
    %132 = vector.broadcast %cst_52 : f32 to vector<8x64xf32>
    %133 = arith.addf %131, %132 : vector<8x64xf32>
    %134 = vector.extract_strided_slice %133 {offsets = [0, 0], sizes = [8, 32], strides = [1, 1]} : vector<8x64xf32> to vector<8x32xf32>
    %135 = vector.extract_strided_slice %133 {offsets = [0, 32], sizes = [8, 32], strides = [1, 1]} : vector<8x64xf32> to vector<8x32xf32>
    %136 = vector.extract_strided_slice %123 {offsets = [0, 64], sizes = [8, 32], strides = [1, 1]} : vector<8x96xf32> to vector<8x32xf32>
    %137 = vector.extract_strided_slice %122 {offsets = [0, 64], sizes = [8, 32], strides = [1, 1]} : vector<8x96xf32> to vector<8x32xf32>
    %138 = vector.broadcast %5 : vector<1x32xf32> to vector<8x32xf32>
    %139 = arith.addf %137, %138 : vector<8x32xf32>
    %140 = arith.mulf %134, %139 : vector<8x32xf32>
    %141 = arith.addf %136, %140 : vector<8x32xf32>
    %142 = math.tanh %141 : vector<8x32xf32>
    %143 = arith.subf %119, %142 : vector<8x32xf32>
    %144 = arith.mulf %135, %143 : vector<8x32xf32>
    %145 = arith.addf %142, %144 : vector<8x32xf32>
    %c32_53 = arith.constant 32 : index
    %c0_54 = arith.constant 0 : index
    %146 = vector.load %arg11[%c32_53, %c0_54] : memref<64x32xf32, #tpu.memory_space<vmem>>, vector<8x32xf32>
    tpu.vector_store %arg11[%c32_53, %c0_54], %145 {strides = array<i32>} : memref<64x32xf32, #tpu.memory_space<vmem>>, vector<8x32xf32>,
    %147 = arith.truncf %145 : vector<8x32xf32> to vector<8x32xbf16>
    %cst_55 = arith.constant dense<0.000000e+00> : vector<8x96xf32>
    %148 = tpu.matmul %147, %1, %cst_55 {dimension_numbers = #tpu.dot_dimension_numbers<[1], [0], [0], [1], [0, 0, 1, 1], [], []>} : vector<8x32xbf16>, vector<32x96xbf16>, vector<8x96xf32> -> vector<8x96xf32>
    %c40 = arith.constant 40 : index
    %c0_56 = arith.constant 0 : index
    %149 = vector.load %arg12[%c40, %c0_56] : memref<64x96xf32, #tpu.memory_space<vmem>>, vector<8x96xf32>
    %150 = vector.extract_strided_slice %149 {offsets = [0, 0], sizes = [8, 64], strides = [1, 1]} : vector<8x96xf32> to vector<8x64xf32>
    %151 = vector.extract_strided_slice %148 {offsets = [0, 0], sizes = [8, 64], strides = [1, 1]} : vector<8x96xf32> to vector<8x64xf32>
    %152 = arith.addf %150, %151 : vector<8x64xf32>
    %cst_57 = arith.constant 5.000000e-01 : f32
    %153 = vector.broadcast %cst_57 : f32 to vector<8x64xf32>
    %154 = arith.mulf %153, %152 : vector<8x64xf32>
    %155 = math.tanh %154 : vector<8x64xf32>
    %cst_58 = arith.constant 5.000000e-01 : f32
    %156 = vector.broadcast %cst_58 : f32 to vector<8x64xf32>
    %157 = arith.mulf %156, %155 : vector<8x64xf32>
    %cst_59 = arith.constant 5.000000e-01 : f32
    %158 = vector.broadcast %cst_59 : f32 to vector<8x64xf32>
    %159 = arith.addf %157, %158 : vector<8x64xf32>
    %160 = vector.extract_strided_slice %159 {offsets = [0, 0], sizes = [8, 32], strides = [1, 1]} : vector<8x64xf32> to vector<8x32xf32>
    %161 = vector.extract_strided_slice %159 {offsets = [0, 32], sizes = [8, 32], strides = [1, 1]} : vector<8x64xf32> to vector<8x32xf32>
    %162 = vector.extract_strided_slice %149 {offsets = [0, 64], sizes = [8, 32], strides = [1, 1]} : vector<8x96xf32> to vector<8x32xf32>
    %163 = vector.extract_strided_slice %148 {offsets = [0, 64], sizes = [8, 32], strides = [1, 1]} : vector<8x96xf32> to vector<8x32xf32>
    %164 = vector.broadcast %5 : vector<1x32xf32> to vector<8x32xf32>
    %165 = arith.addf %163, %164 : vector<8x32xf32>
    %166 = arith.mulf %160, %165 : vector<8x32xf32>
    %167 = arith.addf %162, %166 : vector<8x32xf32>
    %168 = math.tanh %167 : vector<8x32xf32>
    %169 = arith.subf %145, %168 : vector<8x32xf32>
    %170 = arith.mulf %161, %169 : vector<8x32xf32>
    %171 = arith.addf %168, %170 : vector<8x32xf32>
    %c40_60 = arith.constant 40 : index
    %c0_61 = arith.constant 0 : index
    %172 = vector.load %arg11[%c40_60, %c0_61] : memref<64x32xf32, #tpu.memory_space<vmem>>, vector<8x32xf32>
    tpu.vector_store %arg11[%c40_60, %c0_61], %171 {strides = array<i32>} : memref<64x32xf32, #tpu.memory_space<vmem>>, vector<8x32xf32>,
    %173 = arith.truncf %171 : vector<8x32xf32> to vector<8x32xbf16>
    %cst_62 = arith.constant dense<0.000000e+00> : vector<8x96xf32>
    %174 = tpu.matmul %173, %1, %cst_62 {dimension_numbers = #tpu.dot_dimension_numbers<[1], [0], [0], [1], [0, 0, 1, 1], [], []>} : vector<8x32xbf16>, vector<32x96xbf16>, vector<8x96xf32> -> vector<8x96xf32>
    %c48 = arith.constant 48 : index
    %c0_63 = arith.constant 0 : index
    %175 = vector.load %arg12[%c48, %c0_63] : memref<64x96xf32, #tpu.memory_space<vmem>>, vector<8x96xf32>
    %176 = vector.extract_strided_slice %175 {offsets = [0, 0], sizes = [8, 64], strides = [1, 1]} : vector<8x96xf32> to vector<8x64xf32>
    %177 = vector.extract_strided_slice %174 {offsets = [0, 0], sizes = [8, 64], strides = [1, 1]} : vector<8x96xf32> to vector<8x64xf32>
    %178 = arith.addf %176, %177 : vector<8x64xf32>
    %cst_64 = arith.constant 5.000000e-01 : f32
    %179 = vector.broadcast %cst_64 : f32 to vector<8x64xf32>
    %180 = arith.mulf %179, %178 : vector<8x64xf32>
    %181 = math.tanh %180 : vector<8x64xf32>
    %cst_65 = arith.constant 5.000000e-01 : f32
    %182 = vector.broadcast %cst_65 : f32 to vector<8x64xf32>
    %183 = arith.mulf %182, %181 : vector<8x64xf32>
    %cst_66 = arith.constant 5.000000e-01 : f32
    %184 = vector.broadcast %cst_66 : f32 to vector<8x64xf32>
    %185 = arith.addf %183, %184 : vector<8x64xf32>
    %186 = vector.extract_strided_slice %185 {offsets = [0, 0], sizes = [8, 32], strides = [1, 1]} : vector<8x64xf32> to vector<8x32xf32>
    %187 = vector.extract_strided_slice %185 {offsets = [0, 32], sizes = [8, 32], strides = [1, 1]} : vector<8x64xf32> to vector<8x32xf32>
    %188 = vector.extract_strided_slice %175 {offsets = [0, 64], sizes = [8, 32], strides = [1, 1]} : vector<8x96xf32> to vector<8x32xf32>
    %189 = vector.extract_strided_slice %174 {offsets = [0, 64], sizes = [8, 32], strides = [1, 1]} : vector<8x96xf32> to vector<8x32xf32>
    %190 = vector.broadcast %5 : vector<1x32xf32> to vector<8x32xf32>
    %191 = arith.addf %189, %190 : vector<8x32xf32>
    %192 = arith.mulf %186, %191 : vector<8x32xf32>
    %193 = arith.addf %188, %192 : vector<8x32xf32>
    %194 = math.tanh %193 : vector<8x32xf32>
    %195 = arith.subf %171, %194 : vector<8x32xf32>
    %196 = arith.mulf %187, %195 : vector<8x32xf32>
    %197 = arith.addf %194, %196 : vector<8x32xf32>
    %c48_67 = arith.constant 48 : index
    %c0_68 = arith.constant 0 : index
    %198 = vector.load %arg11[%c48_67, %c0_68] : memref<64x32xf32, #tpu.memory_space<vmem>>, vector<8x32xf32>
    tpu.vector_store %arg11[%c48_67, %c0_68], %197 {strides = array<i32>} : memref<64x32xf32, #tpu.memory_space<vmem>>, vector<8x32xf32>,
    %199 = arith.truncf %197 : vector<8x32xf32> to vector<8x32xbf16>
    %cst_69 = arith.constant dense<0.000000e+00> : vector<8x96xf32>
    %200 = tpu.matmul %199, %1, %cst_69 {dimension_numbers = #tpu.dot_dimension_numbers<[1], [0], [0], [1], [0, 0, 1, 1], [], []>} : vector<8x32xbf16>, vector<32x96xbf16>, vector<8x96xf32> -> vector<8x96xf32>
    %c56 = arith.constant 56 : index
    %c0_70 = arith.constant 0 : index
    %201 = vector.load %arg12[%c56, %c0_70] : memref<64x96xf32, #tpu.memory_space<vmem>>, vector<8x96xf32>
    %202 = vector.extract_strided_slice %201 {offsets = [0, 0], sizes = [8, 64], strides = [1, 1]} : vector<8x96xf32> to vector<8x64xf32>
    %203 = vector.extract_strided_slice %200 {offsets = [0, 0], sizes = [8, 64], strides = [1, 1]} : vector<8x96xf32> to vector<8x64xf32>
    %204 = arith.addf %202, %203 : vector<8x64xf32>
    %cst_71 = arith.constant 5.000000e-01 : f32
    %205 = vector.broadcast %cst_71 : f32 to vector<8x64xf32>
    %206 = arith.mulf %205, %204 : vector<8x64xf32>
    %207 = math.tanh %206 : vector<8x64xf32>
    %cst_72 = arith.constant 5.000000e-01 : f32
    %208 = vector.broadcast %cst_72 : f32 to vector<8x64xf32>
    %209 = arith.mulf %208, %207 : vector<8x64xf32>
    %cst_73 = arith.constant 5.000000e-01 : f32
    %210 = vector.broadcast %cst_73 : f32 to vector<8x64xf32>
    %211 = arith.addf %209, %210 : vector<8x64xf32>
    %212 = vector.extract_strided_slice %211 {offsets = [0, 0], sizes = [8, 32], strides = [1, 1]} : vector<8x64xf32> to vector<8x32xf32>
    %213 = vector.extract_strided_slice %211 {offsets = [0, 32], sizes = [8, 32], strides = [1, 1]} : vector<8x64xf32> to vector<8x32xf32>
    %214 = vector.extract_strided_slice %201 {offsets = [0, 64], sizes = [8, 32], strides = [1, 1]} : vector<8x96xf32> to vector<8x32xf32>
    %215 = vector.extract_strided_slice %200 {offsets = [0, 64], sizes = [8, 32], strides = [1, 1]} : vector<8x96xf32> to vector<8x32xf32>
    %216 = vector.broadcast %5 : vector<1x32xf32> to vector<8x32xf32>
    %217 = arith.addf %215, %216 : vector<8x32xf32>
    %218 = arith.mulf %212, %217 : vector<8x32xf32>
    %219 = arith.addf %214, %218 : vector<8x32xf32>
    %220 = math.tanh %219 : vector<8x32xf32>
    %221 = arith.subf %197, %220 : vector<8x32xf32>
    %222 = arith.mulf %213, %221 : vector<8x32xf32>
    %223 = arith.addf %220, %222 : vector<8x32xf32>
    %c56_74 = arith.constant 56 : index
    %c0_75 = arith.constant 0 : index
    %224 = vector.load %arg11[%c56_74, %c0_75] : memref<64x32xf32, #tpu.memory_space<vmem>>, vector<8x32xf32>
    tpu.vector_store %arg11[%c56_74, %c0_75], %223 {strides = array<i32>} : memref<64x32xf32, #tpu.memory_space<vmem>>, vector<8x32xf32>,
    %c0_76 = arith.constant 0 : index
    %c0_77 = arith.constant 0 : index
    %c0_78 = arith.constant 0 : index
    %225 = vector.load %arg10[%c0_76, %c0_77, %c0_78] : memref<2x8x32xf32, #tpu.memory_space<vmem>>, vector<1x8x32xf32>
    %226 = vector.shape_cast %225 : vector<1x8x32xf32> to vector<8x32xf32>
    %227 = vector.shape_cast %223 : vector<8x32xf32> to vector<1x8x32xf32>
    tpu.vector_store %arg10[%c0_76, %c0_77, %c0_78], %227 {strides = array<i32>} : memref<2x8x32xf32, #tpu.memory_space<vmem>>, vector<1x8x32xf32>,
    %c1 = arith.constant 1 : index
    %c0_79 = arith.constant 0 : index
    %c0_80 = arith.constant 0 : index
    %228 = vector.load %arg4[%c1, %c0_79, %c0_80] : memref<2x32x96xbf16, #tpu.memory_space<vmem>>, vector<1x32x96xbf16>
    %229 = vector.shape_cast %228 : vector<1x32x96xbf16> to vector<32x96xbf16>
    %c1_81 = arith.constant 1 : index
    %c0_82 = arith.constant 0 : index
    %c0_83 = arith.constant 0 : index
    %230 = vector.load %arg5[%c1_81, %c0_82, %c0_83] : memref<2x1x96xf32, #tpu.memory_space<vmem>>, vector<1x1x96xf32>
    %231 = vector.shape_cast %230 : vector<1x1x96xf32> to vector<1x96xf32>
    %c1_84 = arith.constant 1 : index
    %c0_85 = arith.constant 0 : index
    %c0_86 = arith.constant 0 : index
    %232 = vector.load %arg6[%c1_84, %c0_85, %c0_86] : memref<2x1x32xf32, #tpu.memory_space<vmem>>, vector<1x1x32xf32>
    %233 = vector.shape_cast %232 : vector<1x1x32xf32> to vector<1x32xf32>
    %c1_87 = arith.constant 1 : index
    %c0_88 = arith.constant 0 : index
    %c0_89 = arith.constant 0 : index
    %234 = vector.load %arg3[%c1_87, %c0_88, %c0_89] : memref<2x32x96xbf16, #tpu.memory_space<vmem>>, vector<1x32x96xbf16>
    %235 = vector.shape_cast %234 : vector<1x32x96xbf16> to vector<32x96xbf16>
    %c0_90 = arith.constant 0 : index
    %c0_91 = arith.constant 0 : index
    %236 = vector.load %arg11[%c0_90, %c0_91] : memref<64x32xf32, #tpu.memory_space<vmem>>, vector<64x32xf32>
    %237 = arith.truncf %236 : vector<64x32xf32> to vector<64x32xbf16>
    %cst_92 = arith.constant dense<0.000000e+00> : vector<64x96xf32>
    %238 = tpu.matmul %237, %235, %cst_92 {dimension_numbers = #tpu.dot_dimension_numbers<[1], [0], [0], [1], [0, 0, 1, 1], [], []>} : vector<64x32xbf16>, vector<32x96xbf16>, vector<64x96xf32> -> vector<64x96xf32>
    %239 = vector.broadcast %231 : vector<1x96xf32> to vector<64x96xf32>
    %240 = arith.addf %238, %239 : vector<64x96xf32>
    %c0_93 = arith.constant 0 : index
    %c0_94 = arith.constant 0 : index
    %241 = vector.load %arg12[%c0_93, %c0_94] : memref<64x96xf32, #tpu.memory_space<vmem>>, vector<64x96xf32>
    tpu.vector_store %arg12[%c0_93, %c0_94], %240 {strides = array<i32>} : memref<64x96xf32, #tpu.memory_space<vmem>>, vector<64x96xf32>,
    %c1_95 = arith.constant 1 : index
    %c0_96 = arith.constant 0 : index
    %c0_97 = arith.constant 0 : index
    %242 = vector.load %arg2[%c1_95, %c0_96, %c0_97] : memref<2x8x32xf32, #tpu.memory_space<vmem>>, vector<1x8x32xf32>
    %243 = vector.shape_cast %242 : vector<1x8x32xf32> to vector<8x32xf32>
    %244 = arith.truncf %243 : vector<8x32xf32> to vector<8x32xbf16>
    %cst_98 = arith.constant dense<0.000000e+00> : vector<8x96xf32>
    %245 = tpu.matmul %244, %229, %cst_98 {dimension_numbers = #tpu.dot_dimension_numbers<[1], [0], [0], [1], [0, 0, 1, 1], [], []>} : vector<8x32xbf16>, vector<32x96xbf16>, vector<8x96xf32> -> vector<8x96xf32>
    %c0_99 = arith.constant 0 : index
    %c0_100 = arith.constant 0 : index
    %246 = vector.load %arg12[%c0_99, %c0_100] : memref<64x96xf32, #tpu.memory_space<vmem>>, vector<8x96xf32>
    %247 = vector.extract_strided_slice %246 {offsets = [0, 0], sizes = [8, 64], strides = [1, 1]} : vector<8x96xf32> to vector<8x64xf32>
    %248 = vector.extract_strided_slice %245 {offsets = [0, 0], sizes = [8, 64], strides = [1, 1]} : vector<8x96xf32> to vector<8x64xf32>
    %249 = arith.addf %247, %248 : vector<8x64xf32>
    %cst_101 = arith.constant 5.000000e-01 : f32
    %250 = vector.broadcast %cst_101 : f32 to vector<8x64xf32>
    %251 = arith.mulf %250, %249 : vector<8x64xf32>
    %252 = math.tanh %251 : vector<8x64xf32>
    %cst_102 = arith.constant 5.000000e-01 : f32
    %253 = vector.broadcast %cst_102 : f32 to vector<8x64xf32>
    %254 = arith.mulf %253, %252 : vector<8x64xf32>
    %cst_103 = arith.constant 5.000000e-01 : f32
    %255 = vector.broadcast %cst_103 : f32 to vector<8x64xf32>
    %256 = arith.addf %254, %255 : vector<8x64xf32>
    %257 = vector.extract_strided_slice %256 {offsets = [0, 0], sizes = [8, 32], strides = [1, 1]} : vector<8x64xf32> to vector<8x32xf32>
    %258 = vector.extract_strided_slice %256 {offsets = [0, 32], sizes = [8, 32], strides = [1, 1]} : vector<8x64xf32> to vector<8x32xf32>
    %259 = vector.extract_strided_slice %246 {offsets = [0, 64], sizes = [8, 32], strides = [1, 1]} : vector<8x96xf32> to vector<8x32xf32>
    %260 = vector.extract_strided_slice %245 {offsets = [0, 64], sizes = [8, 32], strides = [1, 1]} : vector<8x96xf32> to vector<8x32xf32>
    %261 = vector.broadcast %233 : vector<1x32xf32> to vector<8x32xf32>
    %262 = arith.addf %260, %261 : vector<8x32xf32>
    %263 = arith.mulf %257, %262 : vector<8x32xf32>
    %264 = arith.addf %259, %263 : vector<8x32xf32>
    %265 = math.tanh %264 : vector<8x32xf32>
    %266 = arith.subf %243, %265 : vector<8x32xf32>
    %267 = arith.mulf %258, %266 : vector<8x32xf32>
    %268 = arith.addf %265, %267 : vector<8x32xf32>
    %269 = arith.truncf %268 : vector<8x32xf32> to vector<8x32xbf16>
    %cst_104 = arith.constant dense<0.000000e+00> : vector<8x96xf32>
    %270 = tpu.matmul %269, %229, %cst_104 {dimension_numbers = #tpu.dot_dimension_numbers<[1], [0], [0], [1], [0, 0, 1, 1], [], []>} : vector<8x32xbf16>, vector<32x96xbf16>, vector<8x96xf32> -> vector<8x96xf32>
    %c8_105 = arith.constant 8 : index
    %c0_106 = arith.constant 0 : index
    %271 = vector.load %arg12[%c8_105, %c0_106] : memref<64x96xf32, #tpu.memory_space<vmem>>, vector<8x96xf32>
    %272 = vector.extract_strided_slice %271 {offsets = [0, 0], sizes = [8, 64], strides = [1, 1]} : vector<8x96xf32> to vector<8x64xf32>
    %273 = vector.extract_strided_slice %270 {offsets = [0, 0], sizes = [8, 64], strides = [1, 1]} : vector<8x96xf32> to vector<8x64xf32>
    %274 = arith.addf %272, %273 : vector<8x64xf32>
    %cst_107 = arith.constant 5.000000e-01 : f32
    %275 = vector.broadcast %cst_107 : f32 to vector<8x64xf32>
    %276 = arith.mulf %275, %274 : vector<8x64xf32>
    %277 = math.tanh %276 : vector<8x64xf32>
    %cst_108 = arith.constant 5.000000e-01 : f32
    %278 = vector.broadcast %cst_108 : f32 to vector<8x64xf32>
    %279 = arith.mulf %278, %277 : vector<8x64xf32>
    %cst_109 = arith.constant 5.000000e-01 : f32
    %280 = vector.broadcast %cst_109 : f32 to vector<8x64xf32>
    %281 = arith.addf %279, %280 : vector<8x64xf32>
    %282 = vector.extract_strided_slice %281 {offsets = [0, 0], sizes = [8, 32], strides = [1, 1]} : vector<8x64xf32> to vector<8x32xf32>
    %283 = vector.extract_strided_slice %281 {offsets = [0, 32], sizes = [8, 32], strides = [1, 1]} : vector<8x64xf32> to vector<8x32xf32>
    %284 = vector.extract_strided_slice %271 {offsets = [0, 64], sizes = [8, 32], strides = [1, 1]} : vector<8x96xf32> to vector<8x32xf32>
    %285 = vector.extract_strided_slice %270 {offsets = [0, 64], sizes = [8, 32], strides = [1, 1]} : vector<8x96xf32> to vector<8x32xf32>
    %286 = vector.broadcast %233 : vector<1x32xf32> to vector<8x32xf32>
    %287 = arith.addf %285, %286 : vector<8x32xf32>
    %288 = arith.mulf %282, %287 : vector<8x32xf32>
    %289 = arith.addf %284, %288 : vector<8x32xf32>
    %290 = math.tanh %289 : vector<8x32xf32>
    %291 = arith.subf %268, %290 : vector<8x32xf32>
    %292 = arith.mulf %283, %291 : vector<8x32xf32>
    %293 = arith.addf %290, %292 : vector<8x32xf32>
    %294 = arith.truncf %293 : vector<8x32xf32> to vector<8x32xbf16>
    %cst_110 = arith.constant dense<0.000000e+00> : vector<8x96xf32>
    %295 = tpu.matmul %294, %229, %cst_110 {dimension_numbers = #tpu.dot_dimension_numbers<[1], [0], [0], [1], [0, 0, 1, 1], [], []>} : vector<8x32xbf16>, vector<32x96xbf16>, vector<8x96xf32> -> vector<8x96xf32>
    %c16_111 = arith.constant 16 : index
    %c0_112 = arith.constant 0 : index
    %296 = vector.load %arg12[%c16_111, %c0_112] : memref<64x96xf32, #tpu.memory_space<vmem>>, vector<8x96xf32>
    %297 = vector.extract_strided_slice %296 {offsets = [0, 0], sizes = [8, 64], strides = [1, 1]} : vector<8x96xf32> to vector<8x64xf32>
    %298 = vector.extract_strided_slice %295 {offsets = [0, 0], sizes = [8, 64], strides = [1, 1]} : vector<8x96xf32> to vector<8x64xf32>
    %299 = arith.addf %297, %298 : vector<8x64xf32>
    %cst_113 = arith.constant 5.000000e-01 : f32
    %300 = vector.broadcast %cst_113 : f32 to vector<8x64xf32>
    %301 = arith.mulf %300, %299 : vector<8x64xf32>
    %302 = math.tanh %301 : vector<8x64xf32>
    %cst_114 = arith.constant 5.000000e-01 : f32
    %303 = vector.broadcast %cst_114 : f32 to vector<8x64xf32>
    %304 = arith.mulf %303, %302 : vector<8x64xf32>
    %cst_115 = arith.constant 5.000000e-01 : f32
    %305 = vector.broadcast %cst_115 : f32 to vector<8x64xf32>
    %306 = arith.addf %304, %305 : vector<8x64xf32>
    %307 = vector.extract_strided_slice %306 {offsets = [0, 0], sizes = [8, 32], strides = [1, 1]} : vector<8x64xf32> to vector<8x32xf32>
    %308 = vector.extract_strided_slice %306 {offsets = [0, 32], sizes = [8, 32], strides = [1, 1]} : vector<8x64xf32> to vector<8x32xf32>
    %309 = vector.extract_strided_slice %296 {offsets = [0, 64], sizes = [8, 32], strides = [1, 1]} : vector<8x96xf32> to vector<8x32xf32>
    %310 = vector.extract_strided_slice %295 {offsets = [0, 64], sizes = [8, 32], strides = [1, 1]} : vector<8x96xf32> to vector<8x32xf32>
    %311 = vector.broadcast %233 : vector<1x32xf32> to vector<8x32xf32>
    %312 = arith.addf %310, %311 : vector<8x32xf32>
    %313 = arith.mulf %307, %312 : vector<8x32xf32>
    %314 = arith.addf %309, %313 : vector<8x32xf32>
    %315 = math.tanh %314 : vector<8x32xf32>
    %316 = arith.subf %293, %315 : vector<8x32xf32>
    %317 = arith.mulf %308, %316 : vector<8x32xf32>
    %318 = arith.addf %315, %317 : vector<8x32xf32>
    %319 = arith.truncf %318 : vector<8x32xf32> to vector<8x32xbf16>
    %cst_116 = arith.constant dense<0.000000e+00> : vector<8x96xf32>
    %320 = tpu.matmul %319, %229, %cst_116 {dimension_numbers = #tpu.dot_dimension_numbers<[1], [0], [0], [1], [0, 0, 1, 1], [], []>} : vector<8x32xbf16>, vector<32x96xbf16>, vector<8x96xf32> -> vector<8x96xf32>
    %c24_117 = arith.constant 24 : index
    %c0_118 = arith.constant 0 : index
    %321 = vector.load %arg12[%c24_117, %c0_118] : memref<64x96xf32, #tpu.memory_space<vmem>>, vector<8x96xf32>
    %322 = vector.extract_strided_slice %321 {offsets = [0, 0], sizes = [8, 64], strides = [1, 1]} : vector<8x96xf32> to vector<8x64xf32>
    %323 = vector.extract_strided_slice %320 {offsets = [0, 0], sizes = [8, 64], strides = [1, 1]} : vector<8x96xf32> to vector<8x64xf32>
    %324 = arith.addf %322, %323 : vector<8x64xf32>
    %cst_119 = arith.constant 5.000000e-01 : f32
    %325 = vector.broadcast %cst_119 : f32 to vector<8x64xf32>
    %326 = arith.mulf %325, %324 : vector<8x64xf32>
    %327 = math.tanh %326 : vector<8x64xf32>
    %cst_120 = arith.constant 5.000000e-01 : f32
    %328 = vector.broadcast %cst_120 : f32 to vector<8x64xf32>
    %329 = arith.mulf %328, %327 : vector<8x64xf32>
    %cst_121 = arith.constant 5.000000e-01 : f32
    %330 = vector.broadcast %cst_121 : f32 to vector<8x64xf32>
    %331 = arith.addf %329, %330 : vector<8x64xf32>
    %332 = vector.extract_strided_slice %331 {offsets = [0, 0], sizes = [8, 32], strides = [1, 1]} : vector<8x64xf32> to vector<8x32xf32>
    %333 = vector.extract_strided_slice %331 {offsets = [0, 32], sizes = [8, 32], strides = [1, 1]} : vector<8x64xf32> to vector<8x32xf32>
    %334 = vector.extract_strided_slice %321 {offsets = [0, 64], sizes = [8, 32], strides = [1, 1]} : vector<8x96xf32> to vector<8x32xf32>
    %335 = vector.extract_strided_slice %320 {offsets = [0, 64], sizes = [8, 32], strides = [1, 1]} : vector<8x96xf32> to vector<8x32xf32>
    %336 = vector.broadcast %233 : vector<1x32xf32> to vector<8x32xf32>
    %337 = arith.addf %335, %336 : vector<8x32xf32>
    %338 = arith.mulf %332, %337 : vector<8x32xf32>
    %339 = arith.addf %334, %338 : vector<8x32xf32>
    %340 = math.tanh %339 : vector<8x32xf32>
    %341 = arith.subf %318, %340 : vector<8x32xf32>
    %342 = arith.mulf %333, %341 : vector<8x32xf32>
    %343 = arith.addf %340, %342 : vector<8x32xf32>
    %344 = arith.truncf %343 : vector<8x32xf32> to vector<8x32xbf16>
    %cst_122 = arith.constant dense<0.000000e+00> : vector<8x96xf32>
    %345 = tpu.matmul %344, %229, %cst_122 {dimension_numbers = #tpu.dot_dimension_numbers<[1], [0], [0], [1], [0, 0, 1, 1], [], []>} : vector<8x32xbf16>, vector<32x96xbf16>, vector<8x96xf32> -> vector<8x96xf32>
    %c32_123 = arith.constant 32 : index
    %c0_124 = arith.constant 0 : index
    %346 = vector.load %arg12[%c32_123, %c0_124] : memref<64x96xf32, #tpu.memory_space<vmem>>, vector<8x96xf32>
    %347 = vector.extract_strided_slice %346 {offsets = [0, 0], sizes = [8, 64], strides = [1, 1]} : vector<8x96xf32> to vector<8x64xf32>
    %348 = vector.extract_strided_slice %345 {offsets = [0, 0], sizes = [8, 64], strides = [1, 1]} : vector<8x96xf32> to vector<8x64xf32>
    %349 = arith.addf %347, %348 : vector<8x64xf32>
    %cst_125 = arith.constant 5.000000e-01 : f32
    %350 = vector.broadcast %cst_125 : f32 to vector<8x64xf32>
    %351 = arith.mulf %350, %349 : vector<8x64xf32>
    %352 = math.tanh %351 : vector<8x64xf32>
    %cst_126 = arith.constant 5.000000e-01 : f32
    %353 = vector.broadcast %cst_126 : f32 to vector<8x64xf32>
    %354 = arith.mulf %353, %352 : vector<8x64xf32>
    %cst_127 = arith.constant 5.000000e-01 : f32
    %355 = vector.broadcast %cst_127 : f32 to vector<8x64xf32>
    %356 = arith.addf %354, %355 : vector<8x64xf32>
    %357 = vector.extract_strided_slice %356 {offsets = [0, 0], sizes = [8, 32], strides = [1, 1]} : vector<8x64xf32> to vector<8x32xf32>
    %358 = vector.extract_strided_slice %356 {offsets = [0, 32], sizes = [8, 32], strides = [1, 1]} : vector<8x64xf32> to vector<8x32xf32>
    %359 = vector.extract_strided_slice %346 {offsets = [0, 64], sizes = [8, 32], strides = [1, 1]} : vector<8x96xf32> to vector<8x32xf32>
    %360 = vector.extract_strided_slice %345 {offsets = [0, 64], sizes = [8, 32], strides = [1, 1]} : vector<8x96xf32> to vector<8x32xf32>
    %361 = vector.broadcast %233 : vector<1x32xf32> to vector<8x32xf32>
    %362 = arith.addf %360, %361 : vector<8x32xf32>
    %363 = arith.mulf %357, %362 : vector<8x32xf32>
    %364 = arith.addf %359, %363 : vector<8x32xf32>
    %365 = math.tanh %364 : vector<8x32xf32>
    %366 = arith.subf %343, %365 : vector<8x32xf32>
    %367 = arith.mulf %358, %366 : vector<8x32xf32>
    %368 = arith.addf %365, %367 : vector<8x32xf32>
    %369 = arith.truncf %368 : vector<8x32xf32> to vector<8x32xbf16>
    %cst_128 = arith.constant dense<0.000000e+00> : vector<8x96xf32>
    %370 = tpu.matmul %369, %229, %cst_128 {dimension_numbers = #tpu.dot_dimension_numbers<[1], [0], [0], [1], [0, 0, 1, 1], [], []>} : vector<8x32xbf16>, vector<32x96xbf16>, vector<8x96xf32> -> vector<8x96xf32>
    %c40_129 = arith.constant 40 : index
    %c0_130 = arith.constant 0 : index
    %371 = vector.load %arg12[%c40_129, %c0_130] : memref<64x96xf32, #tpu.memory_space<vmem>>, vector<8x96xf32>
    %372 = vector.extract_strided_slice %371 {offsets = [0, 0], sizes = [8, 64], strides = [1, 1]} : vector<8x96xf32> to vector<8x64xf32>
    %373 = vector.extract_strided_slice %370 {offsets = [0, 0], sizes = [8, 64], strides = [1, 1]} : vector<8x96xf32> to vector<8x64xf32>
    %374 = arith.addf %372, %373 : vector<8x64xf32>
    %cst_131 = arith.constant 5.000000e-01 : f32
    %375 = vector.broadcast %cst_131 : f32 to vector<8x64xf32>
    %376 = arith.mulf %375, %374 : vector<8x64xf32>
    %377 = math.tanh %376 : vector<8x64xf32>
    %cst_132 = arith.constant 5.000000e-01 : f32
    %378 = vector.broadcast %cst_132 : f32 to vector<8x64xf32>
    %379 = arith.mulf %378, %377 : vector<8x64xf32>
    %cst_133 = arith.constant 5.000000e-01 : f32
    %380 = vector.broadcast %cst_133 : f32 to vector<8x64xf32>
    %381 = arith.addf %379, %380 : vector<8x64xf32>
    %382 = vector.extract_strided_slice %381 {offsets = [0, 0], sizes = [8, 32], strides = [1, 1]} : vector<8x64xf32> to vector<8x32xf32>
    %383 = vector.extract_strided_slice %381 {offsets = [0, 32], sizes = [8, 32], strides = [1, 1]} : vector<8x64xf32> to vector<8x32xf32>
    %384 = vector.extract_strided_slice %371 {offsets = [0, 64], sizes = [8, 32], strides = [1, 1]} : vector<8x96xf32> to vector<8x32xf32>
    %385 = vector.extract_strided_slice %370 {offsets = [0, 64], sizes = [8, 32], strides = [1, 1]} : vector<8x96xf32> to vector<8x32xf32>
    %386 = vector.broadcast %233 : vector<1x32xf32> to vector<8x32xf32>
    %387 = arith.addf %385, %386 : vector<8x32xf32>
    %388 = arith.mulf %382, %387 : vector<8x32xf32>
    %389 = arith.addf %384, %388 : vector<8x32xf32>
    %390 = math.tanh %389 : vector<8x32xf32>
    %391 = arith.subf %368, %390 : vector<8x32xf32>
    %392 = arith.mulf %383, %391 : vector<8x32xf32>
    %393 = arith.addf %390, %392 : vector<8x32xf32>
    %394 = arith.truncf %393 : vector<8x32xf32> to vector<8x32xbf16>
    %cst_134 = arith.constant dense<0.000000e+00> : vector<8x96xf32>
    %395 = tpu.matmul %394, %229, %cst_134 {dimension_numbers = #tpu.dot_dimension_numbers<[1], [0], [0], [1], [0, 0, 1, 1], [], []>} : vector<8x32xbf16>, vector<32x96xbf16>, vector<8x96xf32> -> vector<8x96xf32>
    %c48_135 = arith.constant 48 : index
    %c0_136 = arith.constant 0 : index
    %396 = vector.load %arg12[%c48_135, %c0_136] : memref<64x96xf32, #tpu.memory_space<vmem>>, vector<8x96xf32>
    %397 = vector.extract_strided_slice %396 {offsets = [0, 0], sizes = [8, 64], strides = [1, 1]} : vector<8x96xf32> to vector<8x64xf32>
    %398 = vector.extract_strided_slice %395 {offsets = [0, 0], sizes = [8, 64], strides = [1, 1]} : vector<8x96xf32> to vector<8x64xf32>
    %399 = arith.addf %397, %398 : vector<8x64xf32>
    %cst_137 = arith.constant 5.000000e-01 : f32
    %400 = vector.broadcast %cst_137 : f32 to vector<8x64xf32>
    %401 = arith.mulf %400, %399 : vector<8x64xf32>
    %402 = math.tanh %401 : vector<8x64xf32>
    %cst_138 = arith.constant 5.000000e-01 : f32
    %403 = vector.broadcast %cst_138 : f32 to vector<8x64xf32>
    %404 = arith.mulf %403, %402 : vector<8x64xf32>
    %cst_139 = arith.constant 5.000000e-01 : f32
    %405 = vector.broadcast %cst_139 : f32 to vector<8x64xf32>
    %406 = arith.addf %404, %405 : vector<8x64xf32>
    %407 = vector.extract_strided_slice %406 {offsets = [0, 0], sizes = [8, 32], strides = [1, 1]} : vector<8x64xf32> to vector<8x32xf32>
    %408 = vector.extract_strided_slice %406 {offsets = [0, 32], sizes = [8, 32], strides = [1, 1]} : vector<8x64xf32> to vector<8x32xf32>
    %409 = vector.extract_strided_slice %396 {offsets = [0, 64], sizes = [8, 32], strides = [1, 1]} : vector<8x96xf32> to vector<8x32xf32>
    %410 = vector.extract_strided_slice %395 {offsets = [0, 64], sizes = [8, 32], strides = [1, 1]} : vector<8x96xf32> to vector<8x32xf32>
    %411 = vector.broadcast %233 : vector<1x32xf32> to vector<8x32xf32>
    %412 = arith.addf %410, %411 : vector<8x32xf32>
    %413 = arith.mulf %407, %412 : vector<8x32xf32>
    %414 = arith.addf %409, %413 : vector<8x32xf32>
    %415 = math.tanh %414 : vector<8x32xf32>
    %416 = arith.subf %393, %415 : vector<8x32xf32>
    %417 = arith.mulf %408, %416 : vector<8x32xf32>
    %418 = arith.addf %415, %417 : vector<8x32xf32>
    %419 = arith.truncf %418 : vector<8x32xf32> to vector<8x32xbf16>
    %cst_140 = arith.constant dense<0.000000e+00> : vector<8x96xf32>
    %420 = tpu.matmul %419, %229, %cst_140 {dimension_numbers = #tpu.dot_dimension_numbers<[1], [0], [0], [1], [0, 0, 1, 1], [], []>} : vector<8x32xbf16>, vector<32x96xbf16>, vector<8x96xf32> -> vector<8x96xf32>
    %c56_141 = arith.constant 56 : index
    %c0_142 = arith.constant 0 : index
    %421 = vector.load %arg12[%c56_141, %c0_142] : memref<64x96xf32, #tpu.memory_space<vmem>>, vector<8x96xf32>
    %422 = vector.extract_strided_slice %421 {offsets = [0, 0], sizes = [8, 64], strides = [1, 1]} : vector<8x96xf32> to vector<8x64xf32>
    %423 = vector.extract_strided_slice %420 {offsets = [0, 0], sizes = [8, 64], strides = [1, 1]} : vector<8x96xf32> to vector<8x64xf32>
    %424 = arith.addf %422, %423 : vector<8x64xf32>
    %cst_143 = arith.constant 5.000000e-01 : f32
    %425 = vector.broadcast %cst_143 : f32 to vector<8x64xf32>
    %426 = arith.mulf %425, %424 : vector<8x64xf32>
    %427 = math.tanh %426 : vector<8x64xf32>
    %cst_144 = arith.constant 5.000000e-01 : f32
    %428 = vector.broadcast %cst_144 : f32 to vector<8x64xf32>
    %429 = arith.mulf %428, %427 : vector<8x64xf32>
    %cst_145 = arith.constant 5.000000e-01 : f32
    %430 = vector.broadcast %cst_145 : f32 to vector<8x64xf32>
    %431 = arith.addf %429, %430 : vector<8x64xf32>
    %432 = vector.extract_strided_slice %431 {offsets = [0, 0], sizes = [8, 32], strides = [1, 1]} : vector<8x64xf32> to vector<8x32xf32>
    %433 = vector.extract_strided_slice %431 {offsets = [0, 32], sizes = [8, 32], strides = [1, 1]} : vector<8x64xf32> to vector<8x32xf32>
    %434 = vector.extract_strided_slice %421 {offsets = [0, 64], sizes = [8, 32], strides = [1, 1]} : vector<8x96xf32> to vector<8x32xf32>
    %435 = vector.extract_strided_slice %420 {offsets = [0, 64], sizes = [8, 32], strides = [1, 1]} : vector<8x96xf32> to vector<8x32xf32>
    %436 = vector.broadcast %233 : vector<1x32xf32> to vector<8x32xf32>
    %437 = arith.addf %435, %436 : vector<8x32xf32>
    %438 = arith.mulf %432, %437 : vector<8x32xf32>
    %439 = arith.addf %434, %438 : vector<8x32xf32>
    %440 = math.tanh %439 : vector<8x32xf32>
    %441 = arith.subf %418, %440 : vector<8x32xf32>
    %442 = arith.mulf %433, %441 : vector<8x32xf32>
    %443 = arith.addf %440, %442 : vector<8x32xf32>
    %c1_146 = arith.constant 1 : index
    %c0_147 = arith.constant 0 : index
    %c0_148 = arith.constant 0 : index
    %444 = vector.load %arg10[%c1_146, %c0_147, %c0_148] : memref<2x8x32xf32, #tpu.memory_space<vmem>>, vector<1x8x32xf32>
    %445 = vector.shape_cast %444 : vector<1x8x32xf32> to vector<8x32xf32>
    %446 = vector.shape_cast %443 : vector<8x32xf32> to vector<1x8x32xf32>
    tpu.vector_store %arg10[%c1_146, %c0_147, %c0_148], %446 {strides = array<i32>} : memref<2x8x32xf32, #tpu.memory_space<vmem>>, vector<1x8x32xf32>,
    %c0_149 = arith.constant 0 : index
    %c0_150 = arith.constant 0 : index
    %447 = vector.load %arg7[%c0_149, %c0_150] : memref<33x30xf32, #tpu.memory_space<vmem>>, vector<33x30xf32>
    %c0_151 = arith.constant 0 : index
    %c0_152 = arith.constant 0 : index
    %448 = vector.load %arg8[%c0_151, %c0_152] : memref<31x1xf32, #tpu.memory_space<vmem>>, vector<31x1xf32>
    %449 = vector.extract_strided_slice %447 {offsets = [0, 0], sizes = [32, 30], strides = [1, 1]} : vector<33x30xf32> to vector<32x30xf32>
    %cst_153 = arith.constant dense<0.000000e+00> : vector<8x30xf32>
    %450 = tpu.matmul %443, %449, %cst_153 {dimension_numbers = #tpu.dot_dimension_numbers<[1], [0], [0], [1], [0, 0, 1, 1], [], []>} : vector<8x32xf32>, vector<32x30xf32>, vector<8x30xf32> -> vector<8x30xf32>
    %451 = vector.extract_strided_slice %447 {offsets = [32, 0], sizes = [1, 30], strides = [1, 1]} : vector<33x30xf32> to vector<1x30xf32>
    %452 = vector.broadcast %451 : vector<1x30xf32> to vector<8x30xf32>
    %453 = arith.addf %450, %452 : vector<8x30xf32>
    %454 = math.tanh %453 : vector<8x30xf32>
    %455 = vector.extract_strided_slice %448 {offsets = [0, 0], sizes = [30, 1], strides = [1, 1]} : vector<31x1xf32> to vector<30x1xf32>
    %cst_154 = arith.constant dense<0.000000e+00> : vector<8x1xf32>
    %456 = tpu.matmul %454, %455, %cst_154 {dimension_numbers = #tpu.dot_dimension_numbers<[1], [0], [0], [1], [0, 0, 1, 1], [], []>} : vector<8x30xf32>, vector<30x1xf32>, vector<8x1xf32> -> vector<8x1xf32>
    %457 = vector.extract_strided_slice %448 {offsets = [30, 0], sizes = [1, 1], strides = [1, 1]} : vector<31x1xf32> to vector<1x1xf32>
    %458 = vector.broadcast %457 : vector<1x1xf32> to vector<8x1xf32>
    %459 = arith.addf %456, %458 : vector<8x1xf32>
    %c0_155 = arith.constant 0 : index
    %c0_156 = arith.constant 0 : index
    %460 = vector.load %arg9[%c0_155, %c0_156] : memref<8x1xf32, #tpu.memory_space<vmem>>, vector<8x1xf32>
    tpu.vector_store %arg9[%c0_155, %c0_156], %459 {strides = array<i32>} : memref<8x1xf32, #tpu.memory_space<vmem>>, vector<8x1xf32>,
    return
  }
  func.func @transform_0(%arg0: i32) -> (i32, i32, i32) {
    %c0_i32 = arith.constant 0 : i32
    %c0_i32_0 = arith.constant 0 : i32
    %c0_i32_1 = arith.constant 0 : i32
    return %c0_i32, %arg0, %c0_i32_0 : i32, i32, i32
  }
  func.func @transform_1(%arg0: i32) -> (i32, i32, i32) {
    %c0_i32 = arith.constant 0 : i32
    %c0_i32_0 = arith.constant 0 : i32
    %c0_i32_1 = arith.constant 0 : i32
    return %c0_i32, %arg0, %c0_i32_0 : i32, i32, i32
  }
  func.func @transform_2(%arg0: i32) -> (i32, i32, i32) {
    %c0_i32 = arith.constant 0 : i32
    %c0_i32_0 = arith.constant 0 : i32
    %c0_i32_1 = arith.constant 0 : i32
    %c0_i32_2 = arith.constant 0 : i32
    return %c0_i32, %c0_i32_0, %c0_i32_1 : i32, i32, i32
  }
  func.func @transform_3(%arg0: i32) -> (i32, i32, i32) {
    %c0_i32 = arith.constant 0 : i32
    %c0_i32_0 = arith.constant 0 : i32
    %c0_i32_1 = arith.constant 0 : i32
    %c0_i32_2 = arith.constant 0 : i32
    return %c0_i32, %c0_i32_0, %c0_i32_1 : i32, i32, i32
  }
  func.func @transform_4(%arg0: i32) -> (i32, i32, i32) {
    %c0_i32 = arith.constant 0 : i32
    %c0_i32_0 = arith.constant 0 : i32
    %c0_i32_1 = arith.constant 0 : i32
    %c0_i32_2 = arith.constant 0 : i32
    return %c0_i32, %c0_i32_0, %c0_i32_1 : i32, i32, i32
  }
  func.func @transform_5(%arg0: i32) -> (i32, i32, i32) {
    %c0_i32 = arith.constant 0 : i32
    %c0_i32_0 = arith.constant 0 : i32
    %c0_i32_1 = arith.constant 0 : i32
    %c0_i32_2 = arith.constant 0 : i32
    return %c0_i32, %c0_i32_0, %c0_i32_1 : i32, i32, i32
  }
  func.func @transform_6(%arg0: i32) -> (i32, i32) {
    %c0_i32 = arith.constant 0 : i32
    %c0_i32_0 = arith.constant 0 : i32
    %c0_i32_1 = arith.constant 0 : i32
    return %c0_i32, %c0_i32_0 : i32, i32
  }
  func.func @transform_7(%arg0: i32) -> (i32, i32) {
    %c0_i32 = arith.constant 0 : i32
    %c0_i32_0 = arith.constant 0 : i32
    %c0_i32_1 = arith.constant 0 : i32
    return %c0_i32, %c0_i32_0 : i32, i32
  }
  func.func @transform_8(%arg0: i32) -> (i32, i32) {
    %c0_i32 = arith.constant 0 : i32
    %c0_i32_0 = arith.constant 0 : i32
    return %arg0, %c0_i32 : i32, i32
  }
  func.func @transform_9(%arg0: i32) -> (i32, i32, i32) {
    %c0_i32 = arith.constant 0 : i32
    %c0_i32_0 = arith.constant 0 : i32
    %c0_i32_1 = arith.constant 0 : i32
    return %c0_i32, %arg0, %c0_i32_0 : i32, i32, i32
  }
}

</mosaic_0001>

<bundles_post_ra>
// kernel: motion_discriminator_forward.1
= control target key start
LH: loop header
LB: loop body
LE: loop exit
PB: predicated region body
PF: predicated region fallthrough
CT: control target
= control target key end

     0   :  { %s1304_s25 = smov 64   ;;  %vm69_vm0 = vcmask 261120   ;;  %vm111_vm1 = vcmask 785408   ;;  %s1305_s28 = smov 32   ;;  %vm1118_vm2 = vcmask 1045504   ;;  %vm1114_vm3 = vcmask 244736   ;;  %s1732_s2 = inlined_call_operand.vmem [shape: bf16[2,32,96], index: 2, kind: input, shape index: {}]   ;;  %s1733_s3 = inlined_call_operand.vmem [shape: bf16[2,32,96], index: 3, kind: input, shape index: {}]   ;;  %s1734_s0 = inlined_call_operand.vmem [shape: f32[8,8,32], index: 0, kind: input, shape index: {}]   ;;  %s1735_s1 = inlined_call_operand.vmem [shape: f32[2,8,32], index: 1, kind: input, shape index: {}]   ;;  %s1736_s5 = inlined_call_operand.vmem [shape: f32[2,1,32], index: 5, kind: input, shape index: {}]   ;;  %s1737_s4 = inlined_call_operand.vmem [shape: f32[2,1,96], index: 4, kind: input, shape index: {}]   ;;  %s1738_s9 = inlined_call_operand.vmem [shape: f32[2,8,32], index: 9, kind: output, shape index: {1}]   ;;  %s1739_s6 = inlined_call_operand.vmem [shape: f32[33,30], index: 6, kind: input, shape index: {}]   ;;  %s1740_s7 = inlined_call_operand.vmem [shape: f32[31,1], index: 7, kind: input, shape index: {}]   ;;  %s1741_s8 = inlined_call_operand.vmem [shape: f32[8,1], index: 8, kind: output, shape index: {0}]  }
   0x1   :  { %v1226_v0 = vld [vmem:[%s1732_s2 + $0x8] sm:$0xff]  ;;  %v1225_v2 = vld [vmem:[%s1732_s2] sm:$0xff]  ;;  %s1306_s29 = smov 96   ;;  %v44_v55 = vld [vmem:[%s1734_s0 + $0x10] sm:$0xff]  ;;  %vm1142_vm4 = vcmask 7168  }
   0x2   :  { %v1363_v1 = vld [vmem:[%s1733_s3 + $0x8] sm:$0xff]  ;;  %v1371_v3 = vld [vmem:[%s1733_s3] sm:$0xff]  ;;  %88 = vmatpush.bf16.msra.mxu0 %v1226_v0  ;;  %v45_v56 = vld [vmem:[%s1734_s0 + $0x18] sm:$0xff] }
   0x3   :  { %v42_v4 = vld [vmem:[%s1734_s0] sm:$0xff]  ;;  %143 = vmatpush.bf16.msra.mxu1 %v1363_v1  ;;  %v43_v5 = vld [vmem:[%s1734_s0 + $0x8] sm:$0xff]  ;;  %206 = vmatpush.bf16.msra.mxu2 %v1363_v1  ;;  %v51_v57 = vpack.c.bf16 %v45_v56, %v44_v55 }
   0x4   :  { %v120_v6 = vld [vmem:[%s1735_s1] sm:$0xff]  ;;  %260 = vmatpush.bf16.msra.mxu3 %v1363_v1  ;;  %v50_v8 = vpack.c.bf16 %v43_v5, %v42_v4 }
   0x5   :  { %v1234_v7 = vld [vmem:[%s1736_s5] ss:$0 sm:$0xff]  ;;  %v121_v9 = vpack.c.bf16 %v120_v6, %v120_v6 }
   0x6   :  { %158 = vrot.lane.b32.xlu0 %v1234_v7, %s1304_s25  ;;  %89 = vmatpush.bf16.msra.mxu0 %v1225_v2  ;;  %v1405_v10 = vld [vmem:[%s1737_s4] ss:$0 sm:$0xff] }
   0x7   :  { %144 = vmatpush.bf16.msra.mxu1 %v1371_v3  ;;  %207 = vmatpush.bf16.msra.mxu2 %v1371_v3 }
   0x8   :  { %261 = vmatpush.bf16.msra.mxu3 %v1371_v3 }
   0x9   :  { %1160 = vmatmul.msk.bf16.vlgmr.msra.gmra.mxu0 %vm69_vm0, %v50_v8 }
   0xa   :  { %1172 = vmatmul.msk.bf16.vlgmr.msra.gmra.mxu1 %vm69_vm0, %v121_v9 }
   0xb   :  { %314 = vmatpush.bf16.msrb.mxu1 %v1363_v1  ;;  %368 = vmatpush.bf16.msrb.mxu2 %v1363_v1 }
   0xc   :  { %422 = vmatpush.bf16.msrb.mxu3 %v1363_v1 }
   0xf   :  { %315 = vmatpush.bf16.msrb.mxu1 %v1371_v3  ;;  %369 = vmatpush.bf16.msrb.mxu2 %v1371_v3 }
  0x10   :  { %423 = vmatpush.bf16.msrb.mxu3 %v1371_v3 }
  0x13   :  { %476 = vmatpush.bf16.msra.mxu1 %v1363_v1 }
  0x17   :  { %477 = vmatpush.bf16.msra.mxu1 %v1371_v3 }
  0x19   :  { %1161 = vmatmul.msk.bf16.gmra.mxu0 %vm69_vm0, %v51_v57 }
  0x78   :  { %v1407_v11 = vpop.permute.xlu0 %158 }
  0x86   :  { %v91_v12 = vpop.f32.mrf.mxu0 }
  0x87   :  { %v146_v13 = vpop.f32.mrf.mxu1  ;;  %v92_v14 = vadd.f32 %v1405_v10, %v91_v12 }
  0x88   :  { %v161_v15 = vadd.f32 %v1407_v11, %v146_v13 }
  0x89   :  { %112 = vst.msk [vmem:[#allocation3] sm:$0xff] %vm111_vm1, %v92_v14 }
  0x8a   :  { %163 = vrot.lane.b32.xlu0 %v161_v15, %s1304_s25 }
  0x8e   :  { %v93_v17 = vpop.f32.mrf.mxu0 }
  0x8f   :  { %v148_v16 = vpop.f32.mrf.mxu1  ;;  %v94_v18 = vadd.f32 %v1405_v10, %v93_v17 }
  0x90   :  { %v150_v19 = vld [vmem:[#allocation3] sm:$0xff] }
  0x91   :  { %113 = vst.msk [vmem:[#allocation3 + $0x8] sm:$0xff] %vm111_vm1, %v94_v18  ;;  %v151_v20 = vadd.f32 %v150_v19, %v146_v13 }
  0x93   :  { %v152_v21 = vmul.f32 0.5, %v151_v20 }
  0x95   :  { %1238 = vtanh.f32 %v152_v21 }
  0x96   :  { %v96_v62 = vpop.f32.mrf.mxu0 }
  0x97   :  { %v97_v63 = vadd.f32 %v1405_v10, %v96_v62 }
  0x98   :  { %v213_v41 = vld [vmem:[#allocation3 + $0x8] sm:$0xff] }
  0x99   :  { %114 = vst.msk [vmem:[#allocation3 + $0x10] sm:$0xff] %vm111_vm1, %v97_v63 }
  0x9b   :  { %v1239_v22 = vpop.eup %1238 }
  0x9c   :  { %v154_v23 = vmul.f32 0.5, %v1239_v22 }
  0x9e   :  { %v155_v24 = vadd.f32 0.5, %v154_v23  ;;  %v98_v0 = vpop.f32.mrf.mxu0 }
  0xa0   :  { %v267_v5 = vld [vmem:[#allocation3 + $0x10] sm:$0xff] }
  0xfc   :  { %v164_v25 = vpop.permute.xlu0 %163 }
  0xfd   :  { %v166_v26 = vmul.f32 %v164_v25, %v155_v24 }
  0xff   :  { %168 = vrot.lane.b32.xlu1 %v166_v26, %s1304_s25 }
 0x171   :  { %v169_v27 = vpop.permute.xlu1 %168 }
 0x172   :  { %v171_v28 = vadd.f32 %v169_v27, %v150_v19 }
 0x174   :  { %1240 = vtanh.f32 %v171_v28 }
 0x17a   :  { %v1241_v29 = vpop.eup %1240 }
 0x17b   :  { %174 = vrot.lane.b32.xlu1 %v1241_v29, %s1304_s25 }
 0x1ed   :  { %v175_v30 = vpop.permute.xlu1 %174 }
 0x1ee   :  { %v177_v31 = vsub.f32 %v120_v6, %v175_v30 }
 0x1f0   :  { %179 = vrot.lane.b32.xlu2 %v177_v31, %s1305_s28 }
 0x24a   :  { %v180_v32 = vpop.permute.xlu2 %179 }
 0x24b   :  { %v182_v33 = vmul.f32 %v180_v32, %v155_v24 }
 0x24d   :  { %184 = vrot.lane.b32.xlu2 %v182_v33, %s1305_s28 }
 0x2a7   :  { %v185_v34 = vpop.permute.xlu2 %184 }
 0x2a8   :  { %v1419_v35 = vadd.f32 %v1241_v29, %v185_v34 }
 0x2aa   :  { %v193_v36 = vpack.c.bf16 %v1419_v35, %v1419_v35 }
 0x2ac   :  { %195 = vrot.lane.b32.xlu0 %v193_v36, %s1304_s25 }
 0x31e   :  { %v196_v37 = vpop.permute.xlu0 %195 }
 0x31f   :  { %1173 = vmatmul.msk.bf16.vlgmr.msra.gmra.mxu2 %vm69_vm0, %v196_v37 }
 0x320   :  { %530 = vmatpush.bf16.msra.mxu2 %v1363_v1  ;;  %v99_v1 = vadd.f32 %v1405_v10, %v98_v0 }
 0x322   :  { %115 = vst.msk [vmem:[#allocation3 + $0x18] sm:$0xff] %vm111_vm1, %v99_v1 }
 0x324   :  { %531 = vmatpush.bf16.msra.mxu2 %v1371_v3 }
 0x329   :  { %v321_v28 = vld [vmem:[#allocation3 + $0x18] sm:$0xff] }
 0x3a2   :  { %v209_v38 = vpop.f32.mrf.mxu2 }
 0x3a3   :  { %v219_v39 = vadd.f32 %v209_v38, %v1407_v11  ;;  %v214_v42 = vadd.f32 %v213_v41, %v209_v38 }
 0x3a5   :  { %221 = vrot.lane.b32.xlu1 %v219_v39, %s1304_s25  ;;  %v215_v43 = vmul.f32 0.5, %v214_v42 }
 0x3a7   :  { %1242 = vtanh.f32 %v215_v43  ;;  %v46_v43 = vld [vmem:[%s1734_s0 + $0x20] sm:$0xff] }
 0x3aa   :  { %v211_v40 = vpop.f32.mrf.mxu2 }
 0x3ad   :  { %v1243_v44 = vpop.eup %1242 }
 0x3ae   :  { %v217_v45 = vmul.f32 0.5, %v1243_v44  ;;  %v47_v44 = vld [vmem:[%s1734_s0 + $0x28] sm:$0xff] }
 0x3b0   :  { %v218_v46 = vadd.f32 0.5, %v217_v45  ;;  %v52_v45 = vpack.c.bf16 %v47_v44, %v46_v43  ;;  %v1531_v44 = vld [vmem:[%s1733_s3 + $0x18] sm:$0xff] }
 0x3b1   :  { %793 = vmatpush.bf16.msrb.mxu0 %v1531_v44 }
 0x3b2   :  { %1162 = vmatmul.msk.bf16.gmra.mxu0 %vm69_vm0, %v52_v45  ;;  %v1537_v45 = vld [vmem:[%s1733_s3 + $0x10] sm:$0xff] }
 0x3b5   :  { %794 = vmatpush.bf16.msrb.mxu0 %v1537_v45 }
 0x3b9   :  { %940 = vmatpush.bf16.msra.mxu0 %v1531_v44 }
 0x3bd   :  { %941 = vmatpush.bf16.msra.mxu0 %v1537_v45 }
 0x417   :  { %v222_v47 = vpop.permute.xlu1 %221 }
 0x418   :  { %v224_v48 = vmul.f32 %v222_v47, %v218_v46 }
 0x41a   :  { %226 = vrot.lane.b32.xlu2 %v224_v48, %s1304_s25 }
 0x474   :  { %v227_v49 = vpop.permute.xlu2 %226 }
 0x475   :  { %v229_v50 = vadd.f32 %v227_v49, %v213_v41  ;;  %v101_v49 = vpop.f32.mrf.mxu0 }
 0x477   :  { %1244 = vtanh.f32 %v229_v50  ;;  %v102_v50 = vadd.f32 %v1405_v10, %v101_v49 }
 0x479   :  { %116 = vst.msk [vmem:[#allocation3 + $0x20] sm:$0xff] %vm111_vm1, %v102_v50  ;;  %v1556_v50 = vld [vmem:[%s1735_s1 + $0x8] sm:$0xff] }
 0x47d   :  { %v1245_v51 = vpop.eup %1244 }
 0x47e   :  { %v231_v52 = vsub.f32 %v1419_v35, %v1245_v51 }
 0x480   :  { %233 = vrot.lane.b32.xlu0 %v231_v52, %s1306_s29  ;;  %v103_v52 = vpop.f32.mrf.mxu0  ;;  %v375_v57 = vld [vmem:[#allocation3 + $0x20] sm:$0xff] }
 0x4f2   :  { %v234_v53 = vpop.permute.xlu0 %233 }
 0x4f3   :  { %v236_v54 = vmul.f32 %v234_v53, %v218_v46  ;;  %v104_v53 = vadd.f32 %v1405_v10, %v103_v52 }
 0x4f5   :  { %238 = vrot.lane.b32.xlu1 %v236_v54, %s1305_s28  ;;  %117 = vst.msk [vmem:[#allocation3 + $0x28] sm:$0xff] %vm111_vm1, %v104_v53  ;;  %v664_v53 = vpack.c.bf16 %v1556_v50, %v1556_v50 }
 0x567   :  { %v239_v58 = vpop.permute.xlu1 %238 }
 0x568   :  { %v1440_v59 = vadd.f32 %v1245_v51, %v239_v58 }
 0x56a   :  { %v247_v60 = vpack.c.bf16 %v1440_v59, %v1440_v59 }
 0x56c   :  { %249 = vrot.lane.b32.xlu2 %v247_v60, %s1304_s25 }
 0x5c6   :  { %v250_v61 = vpop.permute.xlu2 %249 }
 0x5c7   :  { %1174 = vmatmul.msk.bf16.vlgmr.msra.gmra.mxu3 %vm69_vm0, %v250_v61 }
 0x64a   :  { %v263_v2 = vpop.f32.mrf.mxu3 }
 0x64b   :  { %v273_v3 = vadd.f32 %v263_v2, %v1407_v11  ;;  %v268_v6 = vadd.f32 %v267_v5, %v263_v2 }
 0x64d   :  { %275 = vrot.lane.b32.xlu0 %v273_v3, %s1304_s25  ;;  %v269_v7 = vmul.f32 0.5, %v268_v6 }
 0x64f   :  { %1246 = vtanh.f32 %v269_v7 }
 0x652   :  { %v265_v4 = vpop.f32.mrf.mxu3 }
 0x655   :  { %v1247_v8 = vpop.eup %1246 }
 0x656   :  { %v271_v9 = vmul.f32 0.5, %v1247_v8 }
 0x658   :  { %v272_v12 = vadd.f32 0.5, %v271_v9 }
 0x6bf   :  { %v276_v13 = vpop.permute.xlu0 %275 }
 0x6c0   :  { %v278_v14 = vmul.f32 %v276_v13, %v272_v12 }
 0x6c2   :  { %280 = vrot.lane.b32.xlu1 %v278_v14, %s1304_s25 }
 0x734   :  { %v281_v15 = vpop.permute.xlu1 %280 }
 0x735   :  { %v283_v16 = vadd.f32 %v281_v15, %v267_v5 }
 0x737   :  { %1248 = vtanh.f32 %v283_v16 }
 0x73d   :  { %v1249_v17 = vpop.eup %1248 }
 0x73e   :  { %v285_v18 = vsub.f32 %v1440_v59, %v1249_v17 }
 0x740   :  { %287 = vrot.lane.b32.xlu2 %v285_v18, %s1306_s29 }
 0x79a   :  { %v288_v19 = vpop.permute.xlu2 %287 }
 0x79b   :  { %v290_v20 = vmul.f32 %v288_v19, %v272_v12 }
 0x79d   :  { %292 = vrot.lane.b32.xlu0 %v290_v20, %s1305_s28 }
 0x80f   :  { %v293_v21 = vpop.permute.xlu0 %292 }
 0x810   :  { %v1456_v22 = vadd.f32 %v1249_v17, %v293_v21  ;;  %v429_v17 = vld [vmem:[#allocation3 + $0x28] sm:$0xff] }
 0x812   :  { %v301_v23 = vpack.c.bf16 %v1456_v22, %v1456_v22 }
 0x814   :  { %303 = vrot.lane.b32.xlu1 %v301_v23, %s1304_s25 }
 0x886   :  { %v304_v24 = vpop.permute.xlu1 %303 }
 0x887   :  { %1175 = vmatmul.msk.bf16.vlgmr.msrb.gmra.mxu1 %vm69_vm0, %v304_v24 }
 0x888   :  { %686 = vmatpush.bf16.msrb.mxu1 %v1531_v44 }
 0x88c   :  { %687 = vmatpush.bf16.msrb.mxu1 %v1537_v45 }
 0x904   :  { %v317_v25 = vpop.f32.mrf.mxu1 }
 0x905   :  { %v327_v26 = vadd.f32 %v317_v25, %v1407_v11  ;;  %v322_v29 = vadd.f32 %v321_v28, %v317_v25 }
 0x907   :  { %329 = vrot.lane.b32.xlu2 %v327_v26, %s1304_s25  ;;  %v323_v30 = vmul.f32 0.5, %v322_v29 }
 0x909   :  { %1250 = vtanh.f32 %v323_v30 }
 0x90c   :  { %v319_v27 = vpop.f32.mrf.mxu1 }
 0x90f   :  { %v1251_v31 = vpop.eup %1250 }
 0x910   :  { %v325_v32 = vmul.f32 0.5, %v1251_v31 }
 0x912   :  { %v326_v33 = vadd.f32 0.5, %v325_v32 }
 0x961   :  { %v330_v34 = vpop.permute.xlu2 %329 }
 0x962   :  { %v332_v36 = vmul.f32 %v330_v34, %v326_v33  ;;  %v1229_v34 = vld [vmem:[%s1732_s2 + $0x10] sm:$0xff] }
 0x964   :  { %334 = vrot.lane.b32.xlu0 %v332_v36, %s1304_s25  ;;  %v49_v36 = vld [vmem:[%s1734_s0 + $0x38] sm:$0xff] }
 0x9d6   :  { %v335_v37 = vpop.permute.xlu0 %334 }
 0x9d7   :  { %v337_v38 = vadd.f32 %v335_v37, %v321_v28 }
 0x9d9   :  { %1252 = vtanh.f32 %v337_v38 }
 0x9df   :  { %v1253_v39 = vpop.eup %1252 }
 0x9e0   :  { %v339_v40 = vsub.f32 %v1456_v22, %v1253_v39 }
 0x9e2   :  { %341 = vrot.lane.b32.xlu1 %v339_v40, %s1306_s29 }
 0xa54   :  { %v342_v41 = vpop.permute.xlu1 %341 }
 0xa55   :  { %v344_v42 = vmul.f32 %v342_v41, %v326_v33  ;;  %v1230_v33 = vld [vmem:[%s1732_s2 + $0x18] sm:$0xff] }
 0xa56   :  { %631 = vmatpush.bf16.msra.mxu3 %v1230_v33 }
 0xa57   :  { %346 = vrot.lane.b32.xlu2 %v344_v42, %s1305_s28 }
 0xa5a   :  { %632 = vmatpush.bf16.msra.mxu3 %v1229_v34 }
 0xab1   :  { %v347_v46 = vpop.permute.xlu2 %346 }
 0xab2   :  { %v1475_v47 = vadd.f32 %v1253_v39, %v347_v46  ;;  %v1185_v46 = vld [vmem:[%s1736_s5 + $0x1] sm:$0x1] }
 0xab4   :  { %v355_v48 = vpack.c.bf16 %v1475_v47, %v1475_v47 }
 0xab6   :  { %357 = vrot.lane.b32.xlu0 %v355_v48, %s1304_s25  ;;  %v700_v48 = vperm.slane %v1185_v46, 0 }
 0xb28   :  { %v358_v51 = vpop.permute.xlu0 %357 }
 0xb29   :  { %1176 = vmatmul.msk.bf16.vlgmr.msrb.gmra.mxu2 %vm69_vm0, %v358_v51 }
 0xb2a   :  { %744 = vmatpush.bf16.msrb.mxu2 %v1531_v44 }
 0xb2e   :  { %745 = vmatpush.bf16.msrb.mxu2 %v1537_v45 }
 0xbac   :  { %v371_v54 = vpop.f32.mrf.mxu2 }
 0xbad   :  { %v381_v55 = vadd.f32 %v371_v54, %v1407_v11  ;;  %v376_v58 = vadd.f32 %v375_v57, %v371_v54  ;;  %v1568_v54 = vld [vmem:[%s1737_s4 + $0x1] ss:$0 sm:$0xff] }
 0xbaf   :  { %383 = vrot.lane.b32.xlu1 %v381_v55, %s1304_s25  ;;  %v377_v60 = vmul.f32 0.5, %v376_v58 }
 0xbb1   :  { %1254 = vtanh.f32 %v377_v60 }
 0xbb4   :  { %v373_v56 = vpop.f32.mrf.mxu2 }
 0xbb7   :  { %v1255_v61 = vpop.eup %1254 }
 0xbb8   :  { %v379_v62 = vmul.f32 0.5, %v1255_v61 }
 0xbba   :  { %v380_v63 = vadd.f32 0.5, %v379_v62 }
 0xc21   :  { %v384_v0 = vpop.permute.xlu1 %383 }
 0xc22   :  { %v386_v1 = vmul.f32 %v384_v0, %v380_v63 }
 0xc24   :  { %388 = vrot.lane.b32.xlu2 %v386_v1, %s1304_s25 }
 0xc7e   :  { %v389_v2 = vpop.permute.xlu2 %388 }
 0xc7f   :  { %v391_v3 = vadd.f32 %v389_v2, %v375_v57 }
 0xc81   :  { %1256 = vtanh.f32 %v391_v3 }
 0xc87   :  { %v1257_v4 = vpop.eup %1256 }
 0xc88   :  { %v393_v5 = vsub.f32 %v1475_v47, %v1257_v4 }
 0xc8a   :  { %395 = vrot.lane.b32.xlu0 %v393_v5, %s1306_s29 }
 0xcfc   :  { %v396_v6 = vpop.permute.xlu0 %395 }
 0xcfd   :  { %v398_v7 = vmul.f32 %v396_v6, %v380_v63 }
 0xcff   :  { %400 = vrot.lane.b32.xlu1 %v398_v7, %s1305_s28 }
 0xd71   :  { %v401_v8 = vpop.permute.xlu1 %400 }
 0xd72   :  { %v1491_v9 = vadd.f32 %v1257_v4, %v401_v8 }
 0xd74   :  { %v409_v12 = vpack.c.bf16 %v1491_v9, %v1491_v9 }
 0xd76   :  { %411 = vrot.lane.b32.xlu2 %v409_v12, %s1304_s25 }
 0xdd0   :  { %v412_v13 = vpop.permute.xlu2 %411 }
 0xdd1   :  { %1177 = vmatmul.msk.bf16.vlgmr.msrb.gmra.mxu3 %vm69_vm0, %v412_v13 }
 0xe54   :  { %v425_v14 = vpop.f32.mrf.mxu3 }
 0xe55   :  { %v435_v15 = vadd.f32 %v425_v14, %v1407_v11  ;;  %v430_v18 = vadd.f32 %v429_v17, %v425_v14 }
 0xe57   :  { %437 = vrot.lane.b32.xlu0 %v435_v15, %s1304_s25  ;;  %v431_v19 = vmul.f32 0.5, %v430_v18 }
 0xe59   :  { %1258 = vtanh.f32 %v431_v19 }
 0xe5c   :  { %v427_v16 = vpop.f32.mrf.mxu3 }
 0xe5f   :  { %v1259_v20 = vpop.eup %1258 }
 0xe60   :  { %v433_v21 = vmul.f32 0.5, %v1259_v20 }
 0xe62   :  { %v434_v23 = vadd.f32 0.5, %v433_v21 }
 0xec9   :  { %v438_v24 = vpop.permute.xlu0 %437 }
 0xeca   :  { %v440_v25 = vmul.f32 %v438_v24, %v434_v23 }
 0xecc   :  { %442 = vrot.lane.b32.xlu1 %v440_v25, %s1304_s25 }
 0xf3e   :  { %v443_v26 = vpop.permute.xlu1 %442 }
 0xf3f   :  { %v445_v27 = vadd.f32 %v443_v26, %v429_v17 }
 0xf41   :  { %1260 = vtanh.f32 %v445_v27 }
 0xf47   :  { %v1261_v28 = vpop.eup %1260 }
 0xf48   :  { %v447_v29 = vsub.f32 %v1491_v9, %v1261_v28 }
 0xf4a   :  { %449 = vrot.lane.b32.xlu2 %v447_v29, %s1306_s29 }
 0xf52   :  { %189 = vrot.lane.b32.xlu2 %v1419_v35, %s1304_s25  ;;  %v48_v35 = vld [vmem:[%s1734_s0 + $0x30] sm:$0xff] }
 0xf53   :  { %v53_v37 = vpack.c.bf16 %v49_v36, %v48_v35 }
 0xf55   :  { %1163 = vmatmul.msk.bf16.gmra.mxu0 %vm69_vm0, %v53_v37 }
 0xfa4   :  { %v450_v30 = vpop.permute.xlu2 %449 }
 0xfa5   :  { %v452_v31 = vmul.f32 %v450_v30, %v434_v23 }
 0xfa7   :  { %454 = vrot.lane.b32.xlu0 %v452_v31, %s1305_s28 }
 0xfac   :  { %v190_v32 = vpop.permute.xlu2 %189 }
 0xfad   :  { %192 = vst.msk [vmem:[#allocation2] sm:$0xff] %vm69_vm0, %v190_v32 }
 0xfaf   :  { %243 = vrot.lane.b32.xlu0 %v1440_v59, %s1304_s25 }
 0xfb4   :  { %v586_v41 = vld [vmem:[#allocation2] sm:$0xff] }
 0xfd2   :  { %v106_v51 = vpop.f32.mrf.mxu0 }
 0xfd3   :  { %v107_v52 = vadd.f32 %v1405_v10, %v106_v51 }
 0xfd5   :  { %118 = vst.msk [vmem:[#allocation3 + $0x30] sm:$0xff] %vm111_vm1, %v107_v52 }
 0xfda   :  { %v108_v5 = vpop.f32.mrf.mxu0 }
 0xfdb   :  { %v109_v6 = vadd.f32 %v1405_v10, %v108_v5 }
 0xfdc   :  { %v483_v8 = vld [vmem:[#allocation3 + $0x30] sm:$0xff] }
 0xfdd   :  { %119 = vst.msk [vmem:[#allocation3 + $0x38] sm:$0xff] %vm111_vm1, %v109_v6 }
0x1019   :  { %v455_v59 = vpop.permute.xlu0 %454 }
0x101a   :  { %v1521_v38 = vadd.f32 %v1261_v28, %v455_v59 }
0x101c   :  { %v463_v39 = vpack.c.bf16 %v1521_v38, %v1521_v38 }
0x101e   :  { %465 = vrot.lane.b32.xlu1 %v463_v39, %s1304_s25 }
0x1021   :  { %v244_v40 = vpop.permute.xlu0 %243 }
0x1022   :  { %246 = vst.msk [vmem:[#allocation2 + $0x8] sm:$0xff] %vm69_vm0, %v244_v40 }
0x1026   :  { %701 = vrot.lane.b32.xlu1 %v700_v48, %s1304_s25 }
0x1029   :  { %v587_v42 = vld [vmem:[#allocation2 + $0x8] sm:$0xff] }
0x102a   :  { %v594_v43 = vpack.c.bf16 %v587_v42, %v586_v41 }
0x102c   :  { %1198 = vmatmul.msk.bf16.vlgmr.msra.gmra.mxu3 %vm69_vm0, %v594_v43 }
0x1090   :  { %v466_v49 = vpop.permute.xlu1 %465 }
0x1091   :  { %1178 = vmatmul.msk.bf16.vlgmr.msra.gmra.mxu1 %vm69_vm0, %v466_v49 }
0x1092   :  { %842 = vmatpush.bf16.msra.mxu1 %v1531_v44 }
0x1096   :  { %843 = vmatpush.bf16.msra.mxu1 %v1537_v45 }
0x1098   :  { %v1576_v63 = vpop.permute.xlu1 %701 }
0x10a1   :  { %1211 = vmatmul.msk.bf16.vlgmr.msrb.gmra.mxu1 %vm69_vm0, %v664_v53 }
0x10a2   :  { %989 = vmatpush.bf16.msrb.mxu1 %v1531_v44 }
0x10a6   :  { %990 = vmatpush.bf16.msrb.mxu1 %v1537_v45 }
0x10af   :  { %v634_v55 = vpop.f32.mrf.mxu3 }
0x10b0   :  { %v635_v56 = vadd.f32 %v1568_v54, %v634_v55 }
0x10b2   :  { %654 = vst.msk [vmem:[#allocation3] sm:$0xff] %vm111_vm1, %v635_v56 }
0x10b7   :  { %v636_v57 = vpop.f32.mrf.mxu3 }
0x10b8   :  { %v637_v58 = vadd.f32 %v1568_v54, %v636_v57 }
0x10b9   :  { %v693_v3 = vld [vmem:[#allocation3] sm:$0xff] }
0x10ba   :  { %655 = vst.msk [vmem:[#allocation3 + $0x8] sm:$0xff] %vm111_vm1, %v637_v58 }
0x10c1   :  { %v751_v53 = vld [vmem:[#allocation3 + $0x8] sm:$0xff] }
0x110e   :  { %v479_v60 = vpop.f32.mrf.mxu1 }
0x110f   :  { %v489_v61 = vadd.f32 %v479_v60, %v1407_v11  ;;  %v484_v12 = vadd.f32 %v483_v8, %v479_v60 }
0x1111   :  { %491 = vrot.lane.b32.xlu0 %v489_v61, %s1304_s25  ;;  %v485_v13 = vmul.f32 0.5, %v484_v12 }
0x1116   :  { %v481_v62 = vpop.f32.mrf.mxu1 }
0x111e   :  { %v689_v0 = vpop.f32.mrf.mxu1 }
0x111f   :  { %v704_v1 = vadd.f32 %v1576_v63, %v689_v0  ;;  %v694_v4 = vadd.f32 %v693_v3, %v689_v0 }
0x1121   :  { %706 = vrot.lane.b32.xlu2 %v704_v1, %s1304_s25  ;;  %v695_v7 = vmul.f32 0.5, %v694_v4 }
0x1123   :  { %1262 = vtanh.f32 %v695_v7 }
0x1124   :  { %1264 = vtanh.f32 %v485_v13 }
0x1126   :  { %v691_v2 = vpop.f32.mrf.mxu1 }
0x1129   :  { %v1263_v14 = vpop.eup %1262 }
0x112a   :  { %v697_v15 = vmul.f32 0.5, %v1263_v14  ;;  %v1265_v17 = vpop.eup %1264 }
0x112b   :  { %v487_v20 = vmul.f32 0.5, %v1265_v17 }
0x112c   :  { %v698_v16 = vadd.f32 0.5, %v697_v15 }
0x112d   :  { %v488_v21 = vadd.f32 0.5, %v487_v20 }
0x117b   :  { %v707_v18 = vpop.permute.xlu2 %706 }
0x117c   :  { %v709_v19 = vmul.f32 %v707_v18, %v698_v16 }
0x117e   :  { %711 = vrot.lane.b32.xlu1 %v709_v19, %s1304_s25 }
0x1183   :  { %v492_v23 = vpop.permute.xlu0 %491 }
0x1184   :  { %v494_v10 = vmul.f32 %v492_v23, %v488_v21 }
0x1186   :  { %496 = vrot.lane.b32.xlu2 %v494_v10, %s1304_s25 }
0x11e0   :  { %v497_v24 = vpop.permute.xlu2 %496 }
0x11e1   :  { %v499_v25 = vadd.f32 %v497_v24, %v483_v8 }
0x11e3   :  { %1266 = vtanh.f32 %v499_v25 }
0x11e9   :  { %v1267_v26 = vpop.eup %1266 }
0x11ea   :  { %v501_v27 = vsub.f32 %v1521_v38, %v1267_v26 }
0x11ec   :  { %503 = vrot.lane.b32.xlu1 %v501_v27, %s1306_s29 }
0x11f0   :  { %v712_v28 = vpop.permute.xlu1 %711 }
0x11f1   :  { %v714_v29 = vadd.f32 %v712_v28, %v693_v3 }
0x11f3   :  { %1268 = vtanh.f32 %v714_v29 }
0x11f9   :  { %v1269_v30 = vpop.eup %1268 }
0x11fa   :  { %717 = vrot.lane.b32.xlu0 %v1269_v30, %s1304_s25 }
0x125e   :  { %v504_v31 = vpop.permute.xlu1 %503 }
0x125f   :  { %v506_v32 = vmul.f32 %v504_v31, %v488_v21 }
0x1261   :  { %508 = vrot.lane.b32.xlu0 %v506_v32, %s1305_s28 }
0x126c   :  { %v718_v33 = vpop.permute.xlu0 %717 }
0x126d   :  { %v720_v34 = vsub.f32 %v1556_v50, %v718_v33 }
0x126f   :  { %722 = vrot.lane.b32.xlu2 %v720_v34, %s1305_s28 }
0x12c9   :  { %v723_v35 = vpop.permute.xlu2 %722 }
0x12ca   :  { %v725_v36 = vmul.f32 %v723_v35, %v698_v16 }
0x12cc   :  { %727 = vrot.lane.b32.xlu1 %v725_v36, %s1305_s28 }
0x12d3   :  { %v509_v37 = vpop.permute.xlu0 %508 }
0x12d4   :  { %v1591_v59 = vadd.f32 %v1267_v26, %v509_v37 }
0x12d6   :  { %v517_v39 = vpack.c.bf16 %v1591_v59, %v1591_v59 }
0x12d8   :  { %519 = vrot.lane.b32.xlu2 %v517_v39, %s1304_s25 }
0x1332   :  { %v520_v40 = vpop.permute.xlu2 %519 }
0x1333   :  { %1179 = vmatmul.msk.bf16.vlgmr.msra.gmra.mxu2 %vm69_vm0, %v520_v40 }
0x1334   :  { %891 = vmatpush.bf16.msra.mxu2 %v1531_v44 }
0x1338   :  { %892 = vmatpush.bf16.msra.mxu2 %v1537_v45 }
0x133e   :  { %v728_v41 = vpop.permute.xlu1 %727 }
0x133f   :  { %v730_v42 = vadd.f32 %v1269_v30, %v728_v41 }
0x1341   :  { %v731_v43 = vpack.c.bf16 %v730_v42, %v730_v42 }
0x1343   :  { %733 = vrot.lane.b32.xlu0 %v731_v43, %s1304_s25 }
0x13b5   :  { %v734_v46 = vpop.permute.xlu0 %733 }
0x13b6   :  { %v1600_v48 = vpop.f32.mrf.mxu2  ;;  %1212 = vmatmul.msk.bf16.vlgmr.msrb.gmra.mxu2 %vm69_vm0, %v734_v46 }
0x13b7   :  { %1038 = vmatpush.bf16.msrb.mxu2 %v1531_v44 }
0x13bb   :  { %1039 = vmatpush.bf16.msrb.mxu2 %v1537_v45 }
0x13be   :  { %v535_v49 = vpop.f32.mrf.mxu2 }
0x1439   :  { %v747_v50 = vpop.f32.mrf.mxu2 }
0x143a   :  { %v757_v51 = vadd.f32 %v747_v50, %v1576_v63  ;;  %v752_v55 = vadd.f32 %v751_v53, %v747_v50 }
0x143c   :  { %759 = vrot.lane.b32.xlu1 %v757_v51, %s1304_s25  ;;  %v753_v56 = vmul.f32 0.5, %v752_v55 }
0x143e   :  { %1270 = vtanh.f32 %v753_v56 }
0x1441   :  { %v749_v52 = vpop.f32.mrf.mxu2 }
0x1444   :  { %v1271_v57 = vpop.eup %1270 }
0x1445   :  { %v755_v58 = vmul.f32 0.5, %v1271_v57 }
0x1447   :  { %v756_v60 = vadd.f32 0.5, %v755_v58 }
0x14ae   :  { %v760_v61 = vpop.permute.xlu1 %759 }
0x14af   :  { %v762_v62 = vmul.f32 %v760_v61, %v756_v60 }
0x14b1   :  { %764 = vrot.lane.b32.xlu2 %v762_v62, %s1304_s25 }
0x14b9   :  { %297 = vrot.lane.b32.xlu2 %v1456_v22, %s1304_s25 }
0x150b   :  { %v765_v44 = vpop.permute.xlu2 %764 }
0x150c   :  { %v767_v45 = vadd.f32 %v765_v44, %v751_v53 }
0x150e   :  { %1272 = vtanh.f32 %v767_v45 }
0x1513   :  { %v298_v0 = vpop.permute.xlu2 %297 }
0x1514   :  { %v1273_v1 = vpop.eup %1272  ;;  %300 = vst.msk [vmem:[#allocation2 + $0x10] sm:$0xff] %vm69_vm0, %v298_v0 }
0x1515   :  { %v769_v2 = vsub.f32 %v730_v42, %v1273_v1 }
0x1517   :  { %771 = vrot.lane.b32.xlu0 %v769_v2, %s1306_s29 }
0x151b   :  { %v588_v22 = vld [vmem:[#allocation2 + $0x10] sm:$0xff] }
0x151f   :  { %351 = vrot.lane.b32.xlu0 %v1475_v47, %s1304_s25 }
0x1589   :  { %v772_v3 = vpop.permute.xlu0 %771 }
0x158a   :  { %v774_v4 = vmul.f32 %v772_v3, %v756_v60 }
0x158c   :  { %776 = vrot.lane.b32.xlu1 %v774_v4, %s1305_s28 }
0x1591   :  { %v352_v5 = vpop.permute.xlu0 %351 }
0x1592   :  { %354 = vst.msk [vmem:[#allocation2 + $0x18] sm:$0xff] %vm69_vm0, %v352_v5 }
0x1599   :  { %v589_v6 = vld [vmem:[#allocation2 + $0x18] sm:$0xff] }
0x159a   :  { %v595_v7 = vpack.c.bf16 %v589_v6, %v588_v22 }
0x159c   :  { %1199 = vmatmul.msk.bf16.gmra.mxu3 %vm69_vm0, %v595_v7 }
0x15fe   :  { %v777_v8 = vpop.permute.xlu1 %776 }
0x15ff   :  { %v779_v12 = vadd.f32 %v1273_v1, %v777_v8 }
0x1601   :  { %v780_v13 = vpack.c.bf16 %v779_v12, %v779_v12 }
0x1603   :  { %782 = vrot.lane.b32.xlu1 %v780_v13, %s1304_s25 }
0x161f   :  { %v639_v14 = vpop.f32.mrf.mxu3 }
0x1620   :  { %v640_v47 = vadd.f32 %v1568_v54, %v639_v14 }
0x1622   :  { %656 = vst.msk [vmem:[#allocation3 + $0x10] sm:$0xff] %vm111_vm1, %v640_v47 }
0x1627   :  { %v641_v15 = vpop.f32.mrf.mxu3 }
0x1628   :  { %v642_v16 = vadd.f32 %v1568_v54, %v641_v15 }
0x1629   :  { %v800_v21 = vld [vmem:[#allocation3 + $0x10] sm:$0xff] }
0x162a   :  { %657 = vst.msk [vmem:[#allocation3 + $0x18] sm:$0xff] %vm111_vm1, %v642_v16 }
0x1631   :  { %v849_v43 = vld [vmem:[#allocation3 + $0x18] sm:$0xff] }
0x1675   :  { %v783_v17 = vpop.permute.xlu1 %782 }
0x1676   :  { %1213 = vmatmul.msk.bf16.vlgmr.msrb.gmra.mxu0 %vm69_vm0, %v783_v17 }
0x16f3   :  { %v796_v18 = vpop.f32.mrf.mxu0 }
0x16f4   :  { %v806_v19 = vadd.f32 %v796_v18, %v1576_v63  ;;  %v801_v23 = vadd.f32 %v800_v21, %v796_v18 }
0x16f6   :  { %808 = vrot.lane.b32.xlu2 %v806_v19, %s1304_s25  ;;  %v802_v10 = vmul.f32 0.5, %v801_v23 }
0x16f8   :  { %1274 = vtanh.f32 %v802_v10 }
0x16fb   :  { %v798_v20 = vpop.f32.mrf.mxu0 }
0x16fe   :  { %v1275_v24 = vpop.eup %1274 }
0x16ff   :  { %v804_v25 = vmul.f32 0.5, %v1275_v24 }
0x1701   :  { %v805_v26 = vadd.f32 0.5, %v804_v25 }
0x1750   :  { %v809_v27 = vpop.permute.xlu2 %808 }
0x1751   :  { %v811_v28 = vmul.f32 %v809_v27, %v805_v26  ;;  %v543_v27 = vadd.f32 %v1600_v48, %v1407_v11 }
0x1753   :  { %813 = vrot.lane.b32.xlu0 %v811_v28, %s1304_s25 }
0x17c5   :  { %v814_v29 = vpop.permute.xlu0 %813 }
0x17c6   :  { %v816_v30 = vadd.f32 %v814_v29, %v800_v21 }
0x17c8   :  { %1276 = vtanh.f32 %v816_v30 }
0x17ce   :  { %v1277_v31 = vpop.eup %1276 }
0x17cf   :  { %v818_v32 = vsub.f32 %v779_v12, %v1277_v31 }
0x17d1   :  { %820 = vrot.lane.b32.xlu1 %v818_v32, %s1306_s29  ;;  %v537_v32 = vld [vmem:[#allocation3 + $0x38] sm:$0xff] }
0x1843   :  { %v821_v33 = vpop.permute.xlu1 %820 }
0x1844   :  { %v823_v34 = vmul.f32 %v821_v33, %v805_v26  ;;  %v538_v33 = vadd.f32 %v537_v32, %v1600_v48 }
0x1846   :  { %825 = vrot.lane.b32.xlu2 %v823_v34, %s1305_s28  ;;  %v539_v34 = vmul.f32 0.5, %v538_v33 }
0x18a0   :  { %v826_v35 = vpop.permute.xlu2 %825 }
0x18a1   :  { %v828_v36 = vadd.f32 %v1277_v31, %v826_v35 }
0x18a3   :  { %v829_v37 = vpack.c.bf16 %v828_v36, %v828_v36 }
0x18a5   :  { %831 = vrot.lane.b32.xlu0 %v829_v37, %s1304_s25 }
0x1917   :  { %v832_v39 = vpop.permute.xlu0 %831 }
0x1918   :  { %1214 = vmatmul.msk.bf16.vlgmr.msra.gmra.mxu1 %vm69_vm0, %v832_v39 }
0x1995   :  { %v845_v40 = vpop.f32.mrf.mxu1 }
0x1996   :  { %v855_v41 = vadd.f32 %v845_v40, %v1576_v63  ;;  %v850_v46 = vadd.f32 %v849_v43, %v845_v40 }
0x1998   :  { %857 = vrot.lane.b32.xlu1 %v855_v41, %s1304_s25  ;;  %v851_v49 = vmul.f32 0.5, %v850_v46 }
0x199a   :  { %1278 = vtanh.f32 %v851_v49 }
0x199d   :  { %v847_v42 = vpop.f32.mrf.mxu1 }
0x19a0   :  { %v1279_v50 = vpop.eup %1278 }
0x19a1   :  { %v853_v51 = vmul.f32 0.5, %v1279_v50 }
0x19a3   :  { %v854_v52 = vadd.f32 0.5, %v853_v51 }
0x1a0a   :  { %v858_v53 = vpop.permute.xlu1 %857 }
0x1a0b   :  { %v860_v55 = vmul.f32 %v858_v53, %v854_v52 }
0x1a0d   :  { %862 = vrot.lane.b32.xlu2 %v860_v55, %s1304_s25 }
0x1a67   :  { %v863_v56 = vpop.permute.xlu2 %862 }
0x1a68   :  { %v865_v57 = vadd.f32 %v863_v56, %v849_v43 }
0x1a6a   :  { %1280 = vtanh.f32 %v865_v57 }
0x1a70   :  { %v1281_v58 = vpop.eup %1280 }
0x1a71   :  { %v867_v60 = vsub.f32 %v828_v36, %v1281_v58 }
0x1a73   :  { %869 = vrot.lane.b32.xlu0 %v867_v60, %s1306_s29 }
0x1a7b   :  { %405 = vrot.lane.b32.xlu0 %v1491_v9, %s1304_s25 }
0x1ae5   :  { %v870_v61 = vpop.permute.xlu0 %869 }
0x1ae6   :  { %v872_v62 = vmul.f32 %v870_v61, %v854_v52 }
0x1ae8   :  { %874 = vrot.lane.b32.xlu1 %v872_v62, %s1305_s28 }
0x1aed   :  { %v406_v44 = vpop.permute.xlu0 %405 }
0x1aee   :  { %408 = vst.msk [vmem:[#allocation2 + $0x20] sm:$0xff] %vm69_vm0, %v406_v44 }
0x1af0   :  { %459 = vrot.lane.b32.xlu1 %v1521_v38, %s1304_s25 }
0x1af5   :  { %v590_v3 = vld [vmem:[#allocation2 + $0x20] sm:$0xff] }
0x1b5a   :  { %v875_v45 = vpop.permute.xlu1 %874 }
0x1b5b   :  { %v877_v0 = vadd.f32 %v1281_v58, %v875_v45 }
0x1b5d   :  { %v878_v1 = vpack.c.bf16 %v877_v0, %v877_v0 }
0x1b5f   :  { %880 = vrot.lane.b32.xlu2 %v878_v1, %s1304_s25 }
0x1b62   :  { %v460_v2 = vpop.permute.xlu1 %459 }
0x1b63   :  { %462 = vst.msk [vmem:[#allocation2 + $0x28] sm:$0xff] %vm69_vm0, %v460_v2 }
0x1b6a   :  { %v591_v9 = vld [vmem:[#allocation2 + $0x28] sm:$0xff] }
0x1b6b   :  { %v596_v4 = vpack.c.bf16 %v591_v9, %v590_v3 }
0x1b6d   :  { %1200 = vmatmul.msk.bf16.gmra.mxu3 %vm69_vm0, %v596_v4 }
0x1bb9   :  { %v881_v5 = vpop.permute.xlu2 %880 }
0x1bba   :  { %1215 = vmatmul.msk.bf16.vlgmr.msra.gmra.mxu2 %vm69_vm0, %v881_v5 }
0x1bf0   :  { %v644_v22 = vpop.f32.mrf.mxu3 }
0x1bf1   :  { %v645_v6 = vadd.f32 %v1568_v54, %v644_v22 }
0x1bf3   :  { %658 = vst.msk [vmem:[#allocation3 + $0x20] sm:$0xff] %vm111_vm1, %v645_v6 }
0x1bf8   :  { %v646_v38 = vpop.f32.mrf.mxu3 }
0x1bf9   :  { %v647_v7 = vadd.f32 %v1568_v54, %v646_v38 }
0x1bfa   :  { %v898_v14 = vld [vmem:[#allocation3 + $0x20] sm:$0xff] }
0x1bfb   :  { %659 = vst.msk [vmem:[#allocation3 + $0x28] sm:$0xff] %vm111_vm1, %v647_v7 }
0x1c02   :  { %v947_v43 = vld [vmem:[#allocation3 + $0x28] sm:$0xff] }
0x1c3d   :  { %v894_v8 = vpop.f32.mrf.mxu2 }
0x1c3e   :  { %v904_v12 = vadd.f32 %v894_v8, %v1576_v63  ;;  %v899_v47 = vadd.f32 %v898_v14, %v894_v8 }
0x1c40   :  { %906 = vrot.lane.b32.xlu2 %v904_v12, %s1304_s25  ;;  %v900_v15 = vmul.f32 0.5, %v899_v47 }
0x1c42   :  { %1282 = vtanh.f32 %v900_v15 }
0x1c45   :  { %v896_v13 = vpop.f32.mrf.mxu2 }
0x1c48   :  { %v1283_v16 = vpop.eup %1282 }
0x1c49   :  { %v902_v17 = vmul.f32 0.5, %v1283_v16 }
0x1c4b   :  { %v903_v18 = vadd.f32 0.5, %v902_v17 }
0x1c9a   :  { %v907_v19 = vpop.permute.xlu2 %906 }
0x1c9b   :  { %v909_v20 = vmul.f32 %v907_v19, %v903_v18 }
0x1c9d   :  { %911 = vrot.lane.b32.xlu0 %v909_v20, %s1304_s25 }
0x1d0f   :  { %v912_v21 = vpop.permute.xlu0 %911 }
0x1d10   :  { %v914_v23 = vadd.f32 %v912_v21, %v898_v14 }
0x1d12   :  { %1284 = vtanh.f32 %v914_v23 }
0x1d13   :  { %1286 = vtanh.f32 %v539_v34 }
0x1d18   :  { %v1285_v10 = vpop.eup %1284 }
0x1d19   :  { %v916_v24 = vsub.f32 %v877_v0, %v1285_v10  ;;  %v1287_v35 = vpop.eup %1286 }
0x1d1a   :  { %v541_v11 = vmul.f32 0.5, %v1287_v35 }
0x1d1b   :  { %918 = vrot.lane.b32.xlu1 %v916_v24, %s1306_s29 }
0x1d1c   :  { %v542_v40 = vadd.f32 0.5, %v541_v11 }
0x1d8d   :  { %v919_v25 = vpop.permute.xlu1 %918 }
0x1d8e   :  { %v921_v26 = vmul.f32 %v919_v25, %v903_v18 }
0x1d90   :  { %923 = vrot.lane.b32.xlu2 %v921_v26, %s1305_s28 }
0x1d98   :  { %545 = vrot.lane.b32.xlu2 %v543_v27, %s1304_s25 }
0x1dea   :  { %v924_v28 = vpop.permute.xlu2 %923 }
0x1deb   :  { %v926_v29 = vadd.f32 %v1285_v10, %v924_v28 }
0x1ded   :  { %v927_v30 = vpack.c.bf16 %v926_v29, %v926_v29 }
0x1def   :  { %929 = vrot.lane.b32.xlu0 %v927_v30, %s1304_s25 }
0x1df2   :  { %v546_v39 = vpop.permute.xlu2 %545 }
0x1df3   :  { %v548_v42 = vmul.f32 %v546_v39, %v542_v40 }
0x1e61   :  { %v930_v31 = vpop.permute.xlu0 %929 }
0x1e62   :  { %1216 = vmatmul.msk.bf16.vlgmr.msra.gmra.mxu0 %vm69_vm0, %v930_v31 }
0x1edf   :  { %v943_v36 = vpop.f32.mrf.mxu0 }
0x1ee0   :  { %v953_v37 = vadd.f32 %v943_v36, %v1576_v63  ;;  %v948_v46 = vadd.f32 %v947_v43, %v943_v36 }
0x1ee2   :  { %955 = vrot.lane.b32.xlu1 %v953_v37, %s1304_s25  ;;  %v949_v49 = vmul.f32 0.5, %v948_v46 }
0x1ee4   :  { %1288 = vtanh.f32 %v949_v49 }
0x1ee7   :  { %v945_v41 = vpop.f32.mrf.mxu0 }
0x1eea   :  { %550 = vrot.lane.b32.xlu1 %v548_v42, %s1304_s25  ;;  %v1289_v48 = vpop.eup %1288 }
0x1eeb   :  { %v951_v50 = vmul.f32 0.5, %v1289_v48 }
0x1eed   :  { %v952_v51 = vadd.f32 0.5, %v951_v50 }
0x1f54   :  { %v956_v52 = vpop.permute.xlu1 %955 }
0x1f55   :  { %v958_v53 = vmul.f32 %v956_v52, %v952_v51 }
0x1f57   :  { %960 = vrot.lane.b32.xlu0 %v958_v53, %s1304_s25 }
0x1f5c   :  { %v551_v55 = vpop.permute.xlu1 %550 }
0x1f5d   :  { %v553_v56 = vadd.f32 %v551_v55, %v537_v32 }
0x1f5f   :  { %1290 = vtanh.f32 %v553_v56  ;;  %v1083_v56 = vld [vmem:[%s1739_s6 + $0x18] sm:$0xff] }
0x1f60   :  { %1104 = vmatpush.msrb.mxu0 %v1083_v56 }
0x1f65   :  { %v1291_v57 = vpop.eup %1290 }
0x1f66   :  { %v555_v58 = vsub.f32 %v1591_v59, %v1291_v57 }
0x1f68   :  { %557 = vrot.lane.b32.xlu0 %v555_v58, %s1306_s29  ;;  %v1081_v58 = vld [vmem:[%s1739_s6 + $0x8] sm:$0xff] }
0x1f70   :  { %513 = vrot.lane.b32.xlu0 %v1591_v59, %s1304_s25 }
0x1fc9   :  { %v961_v60 = vpop.permute.xlu0 %960 }
0x1fca   :  { %v963_v61 = vadd.f32 %v961_v60, %v947_v43  ;;  %v1080_v60 = vld [vmem:[%s1739_s6] sm:$0xff] }
0x1fcc   :  { %1292 = vtanh.f32 %v963_v61 }
0x1fd2   :  { %v1293_v62 = vpop.eup %1292 }
0x1fd3   :  { %v965_v44 = vsub.f32 %v926_v29, %v1293_v62 }
0x1fd5   :  { %967 = vrot.lane.b32.xlu2 %v965_v44, %s1306_s29  ;;  %v1088_v44 = vld [vmem:[%s1740_s7 + $0x18] sm:$0x7f] }
0x1fd6   :  { %1221 = vmatpush.msk.msra.mxu1 %vm1118_vm2, %v1088_v44 }
0x1fda   :  { %v558_v45 = vpop.permute.xlu0 %557 }
0x1fdb   :  { %v560_v0 = vmul.f32 %v558_v45, %v542_v40  ;;  %v1087_v45 = vld [vmem:[%s1740_s7 + $0x10] sm:$0xff] }
0x1fdc   :  { %1135 = vmatpush.msra.mxu1 %v1087_v45 }
0x1fdd   :  { %562 = vrot.lane.b32.xlu2 %v560_v0, %s1305_s28 }
0x1fe2   :  { %v514_v1 = vpop.permute.xlu0 %513 }
0x1fe3   :  { %516 = vst.msk [vmem:[#allocation2 + $0x30] sm:$0xff] %vm69_vm0, %v514_v1  ;;  %v1086_v1 = vld [vmem:[%s1740_s7 + $0x8] sm:$0xff] }
0x1fe4   :  { %1136 = vmatpush.msra.mxu1 %v1086_v1 }
0x1fea   :  { %v592_v38 = vld [vmem:[#allocation2 + $0x30] sm:$0xff] }
0x202f   :  { %v968_v2 = vpop.permute.xlu2 %967 }
0x2030   :  { %v970_v3 = vmul.f32 %v968_v2, %v952_v51  ;;  %v1085_v2 = vld [vmem:[%s1740_s7] sm:$0xff] }
0x2031   :  { %1137 = vmatpush.msra.mxu1 %v1085_v2 }
0x2032   :  { %972 = vrot.lane.b32.xlu1 %v970_v3, %s1305_s28  ;;  %v1237_v3 = vld [vmem:[%s1739_s6 + $0x20] ss:$0 sm:$0xff] }
0x2037   :  { %v563_v9 = vpop.permute.xlu2 %562 }
0x2038   :  { %v565_v59 = vadd.f32 %v1291_v57, %v563_v9  ;;  %v1082_v57 = vld [vmem:[%s1739_s6 + $0x10] sm:$0xff] }
0x2039   :  { %1105 = vmatpush.msrb.mxu0 %v1082_v57 }
0x203a   :  { %567 = vrot.lane.b32.xlu1 %v565_v59, %s1304_s25 }
0x203b   :  { %1106 = vmatpush.msrb.mxu0 %v1081_v58 }
0x203d   :  { %1107 = vmatpush.msrb.mxu0 %v1080_v60 }
0x20a4   :  { %v973_v4 = vpop.permute.xlu1 %972 }
0x20a5   :  { %v975_v5 = vadd.f32 %v1293_v62, %v973_v4 }
0x20a7   :  { %v976_v22 = vpack.c.bf16 %v975_v5, %v975_v5 }
0x20a9   :  { %978 = vrot.lane.b32.xlu2 %v976_v22, %s1304_s25 }
0x20ac   :  { %v568_v6 = vpop.permute.xlu1 %567 }
0x20ad   :  { %570 = vst.msk [vmem:[#allocation2 + $0x38] sm:$0xff] %vm69_vm0, %v568_v6 }
0x20ae   :  { %571 = vst.msk [vmem:[%s1738_s9] sm:$0xff] %vm69_vm0, %v568_v6 }
0x20b4   :  { %v593_v7 = vld [vmem:[#allocation2 + $0x38] sm:$0xff] }
0x20b5   :  { %v597_v8 = vpack.c.bf16 %v593_v7, %v592_v38 }
0x20b7   :  { %1201 = vmatmul.msk.bf16.gmra.mxu3 %vm69_vm0, %v597_v8 }
0x2103   :  { %v979_v12 = vpop.permute.xlu2 %978 }
0x2104   :  { %1217 = vmatmul.msk.bf16.vlgmr.msrb.gmra.mxu1 %vm69_vm0, %v979_v12 }
0x213a   :  { %v649_v13 = vpop.f32.mrf.mxu3 }
0x213b   :  { %v650_v14 = vadd.f32 %v1568_v54, %v649_v13 }
0x213d   :  { %660 = vst.msk [vmem:[#allocation3 + $0x30] sm:$0xff] %vm111_vm1, %v650_v14 }
0x2142   :  { %v651_v47 = vpop.f32.mrf.mxu3 }
0x2143   :  { %v652_v15 = vadd.f32 %v1568_v54, %v651_v47 }
0x2144   :  { %v996_v19 = vld [vmem:[#allocation3 + $0x30] sm:$0xff] }
0x2145   :  { %661 = vst.msk [vmem:[#allocation3 + $0x38] sm:$0xff] %vm111_vm1, %v652_v15 }
0x214c   :  { %v1045_v39 = vld [vmem:[#allocation3 + $0x38] sm:$0xff] }
0x2181   :  { %v992_v16 = vpop.f32.mrf.mxu1 }
0x2182   :  { %v1002_v17 = vadd.f32 %v992_v16, %v1576_v63  ;;  %v997_v20 = vadd.f32 %v996_v19, %v992_v16 }
0x2184   :  { %1004 = vrot.lane.b32.xlu0 %v1002_v17, %s1304_s25  ;;  %v998_v21 = vmul.f32 0.5, %v997_v20 }
0x2186   :  { %1294 = vtanh.f32 %v998_v21 }
0x2189   :  { %v994_v18 = vpop.f32.mrf.mxu1 }
0x218c   :  { %v1295_v23 = vpop.eup %1294 }
0x218d   :  { %v1000_v10 = vmul.f32 0.5, %v1295_v23 }
0x218f   :  { %v1001_v24 = vadd.f32 0.5, %v1000_v10 }
0x21f6   :  { %v1005_v25 = vpop.permute.xlu0 %1004 }
0x21f7   :  { %v1007_v26 = vmul.f32 %v1005_v25, %v1001_v24 }
0x21f9   :  { %1009 = vrot.lane.b32.xlu1 %v1007_v26, %s1304_s25 }
0x226b   :  { %v1010_v54 = vpop.permute.xlu1 %1009 }
0x226c   :  { %v1012_v27 = vadd.f32 %v1010_v54, %v996_v19 }
0x226e   :  { %1296 = vtanh.f32 %v1012_v27 }
0x2274   :  { %v1297_v28 = vpop.eup %1296 }
0x2275   :  { %v1014_v29 = vsub.f32 %v975_v5, %v1297_v28  ;;  %v1113_v5 = vperm.slane %v1088_v44, 6 }
0x2277   :  { %1016 = vrot.lane.b32.xlu2 %v1014_v29, %s1306_s29 }
0x22d1   :  { %v1017_v30 = vpop.permute.xlu2 %1016 }
0x22d2   :  { %v1019_v31 = vmul.f32 %v1017_v30, %v1001_v24 }
0x22d4   :  { %1021 = vrot.lane.b32.xlu0 %v1019_v31, %s1305_s28 }
0x2346   :  { %v1022_v32 = vpop.permute.xlu0 %1021 }
0x2347   :  { %v1024_v33 = vadd.f32 %v1297_v28, %v1022_v32 }
0x2349   :  { %v1025_v34 = vpack.c.bf16 %v1024_v33, %v1024_v33 }
0x234b   :  { %1027 = vrot.lane.b32.xlu1 %v1025_v34, %s1304_s25 }
0x23bd   :  { %v1028_v35 = vpop.permute.xlu1 %1027 }
0x23be   :  { %1218 = vmatmul.msk.bf16.vlgmr.msrb.gmra.mxu2 %vm69_vm0, %v1028_v35 }
0x2441   :  { %v1041_v36 = vpop.f32.mrf.mxu2 }
0x2442   :  { %v1051_v37 = vadd.f32 %v1041_v36, %v1576_v63  ;;  %v1046_v40 = vadd.f32 %v1045_v39, %v1041_v36 }
0x2444   :  { %1053 = vrot.lane.b32.xlu2 %v1051_v37, %s1304_s25  ;;  %v1047_v41 = vmul.f32 0.5, %v1046_v40 }
0x2446   :  { %1298 = vtanh.f32 %v1047_v41 }
0x2449   :  { %v1043_v11 = vpop.f32.mrf.mxu2 }
0x244c   :  { %v1299_v42 = vpop.eup %1298 }
0x244d   :  { %v1049_v43 = vmul.f32 0.5, %v1299_v42 }
0x244f   :  { %v1050_v46 = vadd.f32 0.5, %v1049_v43 }
0x249e   :  { %v1054_v49 = vpop.permute.xlu2 %1053 }
0x249f   :  { %v1056_v48 = vmul.f32 %v1054_v49, %v1050_v46 }
0x24a1   :  { %1058 = vrot.lane.b32.xlu0 %v1056_v48, %s1304_s25 }
0x2513   :  { %v1059_v50 = vpop.permute.xlu0 %1058 }
0x2514   :  { %v1061_v51 = vadd.f32 %v1059_v50, %v1045_v39 }
0x2516   :  { %1300 = vtanh.f32 %v1061_v51 }
0x251c   :  { %v1301_v52 = vpop.eup %1300 }
0x251d   :  { %v1063_v53 = vsub.f32 %v1024_v33, %v1301_v52 }
0x251f   :  { %1065 = vrot.lane.b32.xlu1 %v1063_v53, %s1306_s29 }
0x2591   :  { %v1066_v63 = vpop.permute.xlu1 %1065 }
0x2592   :  { %v1068_v55 = vmul.f32 %v1066_v63, %v1050_v46 }
0x2594   :  { %1070 = vrot.lane.b32.xlu2 %v1068_v55, %s1305_s28 }
0x25ee   :  { %v1071_v61 = vpop.permute.xlu2 %1070 }
0x25ef   :  { %v1073_v62 = vadd.f32 %v1301_v52, %v1071_v61 }
0x25f1   :  { %1075 = vrot.lane.b32.xlu0 %v1073_v62, %s1304_s25 }
0x2663   :  { %v1076_v0 = vpop.permute.xlu0 %1075 }
0x2664   :  { %1219 = vst.msk [vmem:[%s1738_s9 + $0x8] sm:$0xff] %vm69_vm0, %v1076_v0  ;;  %1220 = vmatmul.msk.f32.vlgmr.msrb.gmra.mxu0 %vm69_vm0, %v1076_v0 }
0x26e1   :  { %v1109_v9 = vpop.f32.mrf.mxu0 }
0x26e2   :  { %v1110_v59 = vadd.f32 %v1237_v3, %v1109_v9 }
0x26e4   :  { %1302 = vtanh.f32 %v1110_v59 }
0x26ea   :  { %v1303_v4 = vpop.eup %1302 }
0x26eb   :  { %1222 = vmatmul.msk.f32.vlgmr.msra.gmra.mxu1 %vm1114_vm3, %v1303_v4 }
0x2768   :  { %v1139_v22 = vpop.f32.mrf.mxu1 }
0x2769   :  { %v1140_v6 = vadd.f32 %v1139_v22, %v1113_v5 }
0x276b   :  { %1143 = vst.msk [vmem:[%s1741_s8] sm:$0xff] %vm1142_vm4, %v1140_v6 }

</bundles_post_ra>
